<compile_context>
chip_gen: v6e
topology: v6e:2x2x1
jax: 0.10.0
libtpu: 0.0.40
codegen_flags: <defaults>
</compile_context>

<pallas_src>
import jax
import jax.numpy as jnp
from jax.experimental import pallas as pl
from jax.experimental.pallas import tpu as pltpu

NEG_SLOPE = 0.1
BN_EPS = 1e-5
_PAD = 8  # sublane-aligned left offset of the data region in the y1 scratch


def _resblock_kernel(x_ref, halo_ref, w1_ref, w2_ref, sb1_ref, sb2_ref,
                     o_ref, y1p_ref, acc_ref):
    # x_ref   : (1, TH, W, C)    input row-tile
    # halo_ref: (1, 2, W, C)     x rows just above / below the tile (zeros at image edge)
    # w1_ref  : (C, Ch)          1x1 conv weight (in, out)
    # w2_ref  : (9, Ch, C)       3x3 taps, k = kh*3 + kw, (in, out) per tap
    # sb1_ref : (2, Ch)          folded BN1 scale / bias
    # sb2_ref : (2, C)           folded BN2 scale / bias
    # o_ref   : (1, TH, W, C)
    # y1p_ref : (TH+2, W+9, Ch)  VMEM scratch: zero-padded conv1 output
    # acc_ref : (TH*W, C)        VMEM f32 accumulator for the 3x3 conv
    _, TH, W, C = x_ref.shape
    Ch = w1_ref.shape[1]

    i = pl.program_id(1)
    n_tiles = pl.num_programs(1)

    # ---- conv1 (1x1) + BN1 + LeakyReLU on the tile rows plus 1-row halo each side
    x_core = x_ref[0]                              # (TH, W, C)
    halo = halo_ref[0]                             # (2, W, C)
    x_ext = jnp.concatenate([halo[0:1], x_core, halo[1:2]], axis=0)   # (TH+2, W, C)

    y1 = jnp.dot(x_ext.reshape((TH + 2) * W, C), w1_ref[...],
                 preferred_element_type=jnp.float32)
    y1 = y1 * sb1_ref[0:1, :] + sb1_ref[1:2, :]
    y1 = jnp.where(y1 > 0, y1, NEG_SLOPE * y1)
    y1 = y1.reshape(TH + 2, W, Ch)

    # Halo rows that fall outside the image must be ZERO (they are conv2's zero
    # padding, not conv1 applied to zeros).
    rows = jax.lax.broadcasted_iota(jnp.int32, (TH + 2, 1, 1), 0)
    row_ok = ((rows != 0) | (i != 0)) & ((rows != TH + 1) | (i != n_tiles - 1))
    y1 = jnp.where(row_ok, y1, 0.0)

    # ---- in-kernel pad=1 halo: zero-init scratch, store data at aligned offset 8
    y1p_ref[...] = jnp.zeros_like(y1p_ref)
    y1p_ref[:, _PAD:_PAD + W, :] = y1
    y1p = y1p_ref[...]                             # (TH+2, W+9, Ch)

    # ---- conv2 (3x3): 9 shifted-window matmuls accumulated in a VMEM scratch
    for k in range(9):
        dh, dw = k // 3, k % 3
        win = y1p[dh:dh + TH, _PAD - 1 + dw:_PAD - 1 + dw + W, :]
        tap = jnp.dot(win.reshape(TH * W, Ch), w2_ref[k],
                      preferred_element_type=jnp.float32)
        if k == 0:
            acc_ref[...] = tap
        else:
            acc_ref[...] += tap

    # ---- BN2 + LeakyReLU + residual
    y2 = acc_ref[...] * sb2_ref[0:1, :] + sb2_ref[1:2, :]
    y2 = jnp.where(y2 > 0, y2, NEG_SLOPE * y2)
    out = y2 + x_core.reshape(TH * W, C)
    o_ref[...] = out.reshape(1, TH, W, C).astype(o_ref.dtype)


def _pick_tile_h(H, W, C, Ch, budget_bytes=12 * 1024 * 1024):
    """Largest row-tile dividing H whose per-step VMEM working set (double-
    buffered in/out tiles + weights + scratch) stays under the budget.  The
    budget is conservative so tiles fit the 32 MiB scoped default and v7x's
    64 MiB physical VMEM."""
    def vmem_bytes(th):
        tile = th * W * C * 4
        halo = 2 * W * C * 4
        wgt = (C * Ch + 9 * Ch * C + 2 * Ch + 2 * C) * 4
        y1p = (th + 2) * (W + 9) * Ch * 4
        acc = th * W * C * 4
        return 2 * (2 * tile + halo + wgt) + y1p + acc
    best = 1
    for th in range(1, H + 1):
        if H % th == 0 and vmem_bytes(th) <= budget_bytes:
            best = th
    return best


def res_block_nhwc(x, params, tile_h=None):
    """Fused ResBlock forward on NHWC input (preferred entry point)."""
    w1, sb1, w2, sb2 = params["w1"], params["sb1"], params["w2"], params["sb2"]
    N, H, W, C = x.shape
    Ch = w1.shape[1]
    if tile_h is None:
        tile_h = _pick_tile_h(H, W, C, Ch)
    assert H % tile_h == 0, "tile_h must divide H"
    num_t = H // tile_h

    # Row halos: tile i needs x rows i*tile_h - 1 and (i+1)*tile_h (zeros at edges).
    zrow = jnp.zeros((N, 1, W, C), x.dtype)
    top = jnp.concatenate([zrow, x[:, tile_h - 1:H - 1:tile_h]], axis=1)
    bot = jnp.concatenate([x[:, tile_h:H:tile_h], zrow], axis=1)
    halo = jnp.stack([top, bot], axis=2).reshape(N * num_t, 2, W, C)

    flops = 2 * N * H * W * (C * Ch + 9 * Ch * C)
    bytes_accessed = 4 * int(2 * x.size + halo.size + w1.size + w2.size
                             + sb1.size + sb2.size)

    grid_spec = pltpu.PrefetchScalarGridSpec(
        num_scalar_prefetch=0,
        grid=(N, num_t),
        in_specs=[
            pl.BlockSpec((1, tile_h, W, C), lambda n, i: (n, i, 0, 0)),
            pl.BlockSpec((1, 2, W, C), lambda n, i: (n * num_t + i, 0, 0, 0)),
            pl.BlockSpec((C, Ch), lambda n, i: (0, 0)),
            pl.BlockSpec((9, Ch, C), lambda n, i: (0, 0, 0)),
            pl.BlockSpec((2, Ch), lambda n, i: (0, 0)),
            pl.BlockSpec((2, C), lambda n, i: (0, 0)),
        ],
        out_specs=pl.BlockSpec((1, tile_h, W, C), lambda n, i: (n, i, 0, 0)),
        scratch_shapes=[
            pltpu.VMEM((tile_h + 2, W + 9, Ch), jnp.float32),
            pltpu.VMEM((tile_h * W, C), jnp.float32),
        ],
    )
    return pl.pallas_call(
        _resblock_kernel,
        out_shape=jax.ShapeDtypeStruct((N, H, W, C), x.dtype),
        grid_spec=grid_spec,
        compiler_params=pltpu.CompilerParams(
            dimension_semantics=("parallel", "parallel"),
            vmem_limit_bytes=48 * 1024 * 1024,
        ),
        cost_estimate=pl.CostEstimate(
            flops=flops, transcendentals=0, bytes_accessed=bytes_accessed),
    )(x, halo, w1, w2, sb1, sb2)


def res_block(x_nchw, params, tile_h=None):
    """PyTorch-style NCHW wrapper.  In an NHWC model call res_block_nhwc
    directly and skip these two full-tensor transposes (extra HBM passes)."""
    x = jnp.transpose(x_nchw, (0, 2, 3, 1)).astype(jnp.float32)
    out = res_block_nhwc(x, params, tile_h=tile_h)
    return jnp.transpose(out, (0, 3, 1, 2))


def _round_bf16(a):
    # Values exactly representable in bf16 make the default-precision MXU path
    # (bf16 multiplies, f32 accumulation) agree with the f32 reference closely.
    return a.astype(jnp.bfloat16).astype(jnp.float32)


def init_params(key, in_channels):
    """Deterministic synthetic parameters (PyTorch shapes + kernel layout)."""
    C = in_channels
    Ch = C // 2
    ks = jax.random.split(key, 10)
    # torch-layout conv weights (out, in, kh, kw), bias=False (BN follows)
    w1_t = _round_bf16(jax.random.normal(ks[0], (Ch, C, 1, 1), jnp.float32) * 0.1)
    w2_t = _round_bf16(jax.random.normal(ks[1], (C, Ch, 3, 3), jnp.float32) * 0.1)

    def bn_fold(kg, kb, km, kv, n):
        gamma = 1.0 + 0.1 * jax.random.normal(kg, (n,), jnp.float32)
        beta = 0.1 * jax.random.normal(kb, (n,), jnp.float32)
        mean = 0.1 * jax.random.normal(km, (n,), jnp.float32)
        var = 1.0 + 0.1 * jnp.abs(jax.random.normal(kv, (n,), jnp.float32))
        scale = gamma / jnp.sqrt(var + BN_EPS)
        bias = beta - mean * scale
        return jnp.stack([scale, bias], axis=0)                    # (2, n)

    sb1 = bn_fold(ks[2], ks[3], ks[4], ks[5], Ch)
    sb2 = bn_fold(ks[6], ks[7], ks[8], ks[9], C)

    # kernel layouts
    w1 = jnp.transpose(w1_t[:, :, 0, 0], (1, 0))                   # (C, Ch)
    w2 = jnp.transpose(w2_t, (2, 3, 1, 0)).reshape(9, Ch, C)       # (9, Ch, C)
    params = dict(w1=w1, sb1=sb1, w2=w2, sb2=sb2)
    return params, (w1_t, w2_t, sb1, sb2)


def reference(x_nchw, w1_t, w2_t, sb1, sb2):
    """Plain-JAX reference of the ResBlock forward (eval-mode BN folded)."""
    x = jnp.transpose(x_nchw, (0, 2, 3, 1))
    w1 = jnp.transpose(w1_t, (2, 3, 1, 0))   # HWIO
    w2 = jnp.transpose(w2_t, (2, 3, 1, 0))   # HWIO
    dn = ('NHWC', 'HWIO', 'NHWC')
    y = jax.lax.conv_general_dilated(x, w1, (1, 1), 'VALID', dimension_numbers=dn)
    y = y * sb1[0] + sb1[1]
    y = jnp.where(y > 0, y, NEG_SLOPE * y)
    y = jax.lax.conv_general_dilated(y, w2, (1, 1), 'SAME', dimension_numbers=dn)
    y = y * sb2[0] + sb2[1]
    y = jnp.where(y > 0, y, NEG_SLOPE * y)
    y = y + x
    return jnp.transpose(y, (0, 3, 1, 2))


if __name__ == "__main__":
    key = jax.random.PRNGKey(0)
    kx, kp = jax.random.split(key)

    in_channels = 4                                   # must be even
    x = _round_bf16(jax.random.normal(kx, (2, in_channels, 16, 16), jnp.float32))
    params, (w1_t, w2_t, sb1, sb2) = init_params(kp, in_channels)

    ref = reference(x, w1_t, w2_t, sb1, sb2)
    run = jax.jit(res_block, static_argnames=("tile_h",))

    # tile_h=8 exercises the multi-tile halo path; tile_h=16 the single-tile path.
    for th in (8, 16):
        out = jax.block_until_ready(run(x, params, tile_h=th))
        assert out.shape == x.shape and out.dtype == jnp.float32
        assert bool(jnp.allclose(out, ref, rtol=1e-3, atol=1e-3)), \
            f"mismatch vs reference (tile_h={th})"
    print("KERNEL_OK")
</pallas_src>

<mosaic_0001>
module attributes {stable_mosaic.version = 11 : i64} {
  func.func @_resblock_kernel(%arg0: i32, %arg1: i32, %arg2: memref<1x8x16x4xf32, #tpu.memory_space<vmem>>, %arg3: memref<1x2x16x4xf32, #tpu.memory_space<vmem>>, %arg4: memref<4x2xf32, #tpu.memory_space<vmem>>, %arg5: memref<9x2x4xf32, #tpu.memory_space<vmem>>, %arg6: memref<2x2xf32, #tpu.memory_space<vmem>>, %arg7: memref<2x4xf32, #tpu.memory_space<vmem>>, %arg8: memref<1x8x16x4xf32, #tpu.memory_space<vmem>>, %arg9: memref<10x25x2xf32, #tpu.memory_space<vmem>>, %arg10: memref<128x4xf32, #tpu.memory_space<vmem>>) attributes {dimension_semantics = [#tpu.dimension_semantics<parallel>, #tpu.dimension_semantics<parallel>], iteration_bounds = array<i64: 2, 2>, scalar_prefetch = 0 : i64, scratch_operands = 2 : i64, tpu.core_type = #tpu.core_type<tc>, window_params = [{transform_indices = @transform_0, window_bounds = array<i64: 1, 8, 16, 4>}, {transform_indices = @transform_1, window_bounds = array<i64: 1, 2, 16, 4>}, {pipeline_mode = #tpu.pipeline_mode<synchronous>, transform_indices = @transform_2, window_bounds = array<i64: 4, 2>}, {pipeline_mode = #tpu.pipeline_mode<synchronous>, transform_indices = @transform_3, window_bounds = array<i64: 9, 2, 4>}, {pipeline_mode = #tpu.pipeline_mode<synchronous>, transform_indices = @transform_4, window_bounds = array<i64: 2, 2>}, {pipeline_mode = #tpu.pipeline_mode<synchronous>, transform_indices = @transform_5, window_bounds = array<i64: 2, 4>}, {transform_indices = @transform_6, window_bounds = array<i64: 1, 8, 16, 4>}]} {
    %c0 = arith.constant 0 : index
    %c0_0 = arith.constant 0 : index
    %c0_1 = arith.constant 0 : index
    %c0_2 = arith.constant 0 : index
    %0 = vector.load %arg2[%c0, %c0_0, %c0_1, %c0_2] : memref<1x8x16x4xf32, #tpu.memory_space<vmem>>, vector<1x8x16x4xf32>
    %1 = vector.shape_cast %0 : vector<1x8x16x4xf32> to vector<8x16x4xf32>
    %c0_3 = arith.constant 0 : index
    %c0_4 = arith.constant 0 : index
    %c0_5 = arith.constant 0 : index
    %c0_6 = arith.constant 0 : index
    %2 = vector.load %arg3[%c0_3, %c0_4, %c0_5, %c0_6] : memref<1x2x16x4xf32, #tpu.memory_space<vmem>>, vector<1x2x16x4xf32>
    %3 = vector.shape_cast %2 : vector<1x2x16x4xf32> to vector<2x16x4xf32>
    %4 = vector.extract_strided_slice %3 {offsets = [0, 0, 0], sizes = [1, 16, 4], strides = [1, 1, 1]} : vector<2x16x4xf32> to vector<1x16x4xf32>
    %5 = vector.extract_strided_slice %3 {offsets = [1, 0, 0], sizes = [1, 16, 4], strides = [1, 1, 1]} : vector<2x16x4xf32> to vector<1x16x4xf32>
    %6 = tpu.concatenate %4, %1, %5 in 0 : vector<1x16x4xf32>, vector<8x16x4xf32>, vector<1x16x4xf32> -> vector<10x16x4xf32>
    %7 = vector.shape_cast %6 : vector<10x16x4xf32> to vector<160x4xf32>
    %c0_7 = arith.constant 0 : index
    %c0_8 = arith.constant 0 : index
    %8 = vector.load %arg4[%c0_7, %c0_8] : memref<4x2xf32, #tpu.memory_space<vmem>>, vector<4x2xf32>
    %cst = arith.constant dense<0.000000e+00> : vector<160x2xf32>
    %9 = tpu.matmul %7, %8, %cst {dimension_numbers = #tpu.dot_dimension_numbers<[1], [0], [0], [1], [0, 0, 1, 1], [], []>} : vector<160x4xf32>, vector<4x2xf32>, vector<160x2xf32> -> vector<160x2xf32>
    %c0_9 = arith.constant 0 : index
    %c0_10 = arith.constant 0 : index
    %10 = vector.load %arg6[%c0_9, %c0_10] : memref<2x2xf32, #tpu.memory_space<vmem>>, vector<1x2xf32>
    %11 = vector.broadcast %10 : vector<1x2xf32> to vector<160x2xf32>
    %12 = arith.mulf %9, %11 : vector<160x2xf32>
    %c1 = arith.constant 1 : index
    %c0_11 = arith.constant 0 : index
    %13 = vector.load %arg6[%c1, %c0_11] : memref<2x2xf32, #tpu.memory_space<vmem>>, vector<1x2xf32>
    %14 = vector.broadcast %13 : vector<1x2xf32> to vector<160x2xf32>
    %15 = arith.addf %12, %14 : vector<160x2xf32>
    %cst_12 = arith.constant 0.000000e+00 : f32
    %16 = vector.broadcast %cst_12 : f32 to vector<160x2xf32>
    %17 = arith.cmpf ogt, %15, %16 : vector<160x2xf32>
    %cst_13 = arith.constant 1.000000e-01 : f32
    %18 = vector.broadcast %cst_13 : f32 to vector<160x2xf32>
    %19 = arith.mulf %18, %15 : vector<160x2xf32>
    %20 = arith.select %17, %15, %19 : vector<160x2xi1>, vector<160x2xf32>
    %21 = vector.shape_cast %20 : vector<160x2xf32> to vector<10x16x2xf32>
    %22 = tpu.iota {dimensions = array<i32: 0>} : vector<10x1x1xi32>
    %c0_i32 = arith.constant 0 : i32
    %23 = vector.broadcast %c0_i32 : i32 to vector<10x1x1xi32>
    %24 = arith.cmpi ne, %22, %23 : vector<10x1x1xi32>
    %c0_i32_14 = arith.constant 0 : i32
    %25 = arith.cmpi ne, %arg1, %c0_i32_14 : i32
    %26 = vector.broadcast %25 : i1 to vector<10x1x1xi1>
    %27 = arith.ori %24, %26 : vector<10x1x1xi1>
    %c9_i32 = arith.constant 9 : i32
    %28 = vector.broadcast %c9_i32 : i32 to vector<10x1x1xi32>
    %29 = arith.cmpi ne, %22, %28 : vector<10x1x1xi32>
    %c1_i32 = arith.constant 1 : i32
    %30 = arith.cmpi ne, %arg1, %c1_i32 : i32
    %31 = vector.broadcast %30 : i1 to vector<10x1x1xi1>
    %32 = arith.ori %29, %31 : vector<10x1x1xi1>
    %33 = arith.andi %27, %32 : vector<10x1x1xi1>
    %cst_15 = arith.constant 0.000000e+00 : f32
    %34 = vector.shape_cast %33 : vector<10x1x1xi1> to vector<10x1x1xi1>
    %35 = vector.broadcast %34 : vector<10x1x1xi1> to vector<10x16x2xi1>
    %36 = vector.broadcast %cst_15 : f32 to vector<10x16x2xf32>
    %37 = arith.select %35, %21, %36 : vector<10x16x2xi1>, vector<10x16x2xf32>
    %cst_16 = arith.constant 0.000000e+00 : f32
    %38 = vector.broadcast %cst_16 : f32 to vector<10x25x2xf32>
    %c0_17 = arith.constant 0 : index
    %c0_18 = arith.constant 0 : index
    %c0_19 = arith.constant 0 : index
    %39 = vector.load %arg9[%c0_17, %c0_18, %c0_19] : memref<10x25x2xf32, #tpu.memory_space<vmem>>, vector<10x25x2xf32>
    tpu.vector_store %arg9[%c0_17, %c0_18, %c0_19], %38 {strides = array<i32>} : memref<10x25x2xf32, #tpu.memory_space<vmem>>, vector<10x25x2xf32>,
    %c0_20 = arith.constant 0 : index
    %c8 = arith.constant 8 : index
    %c0_21 = arith.constant 0 : index
    %40 = vector.load %arg9[%c0_20, %c8, %c0_21] : memref<10x25x2xf32, #tpu.memory_space<vmem>>, vector<10x16x2xf32>
    tpu.vector_store %arg9[%c0_20, %c8, %c0_21], %37 {strides = array<i32>} : memref<10x25x2xf32, #tpu.memory_space<vmem>>, vector<10x16x2xf32>,
    %c0_22 = arith.constant 0 : index
    %c0_23 = arith.constant 0 : index
    %c0_24 = arith.constant 0 : index
    %41 = vector.load %arg9[%c0_22, %c0_23, %c0_24] : memref<10x25x2xf32, #tpu.memory_space<vmem>>, vector<10x25x2xf32>
    %42 = vector.extract_strided_slice %41 {offsets = [0, 7, 0], sizes = [8, 16, 2], strides = [1, 1, 1]} : vector<10x25x2xf32> to vector<8x16x2xf32>
    %43 = vector.shape_cast %42 : vector<8x16x2xf32> to vector<128x2xf32>
    %c0_25 = arith.constant 0 : index
    %c0_26 = arith.constant 0 : index
    %c0_27 = arith.constant 0 : index
    %44 = vector.load %arg5[%c0_25, %c0_26, %c0_27] : memref<9x2x4xf32, #tpu.memory_space<vmem>>, vector<1x2x4xf32>
    %45 = vector.shape_cast %44 : vector<1x2x4xf32> to vector<2x4xf32>
    %cst_28 = arith.constant dense<0.000000e+00> : vector<128x4xf32>
    %46 = tpu.matmul %43, %45, %cst_28 {dimension_numbers = #tpu.dot_dimension_numbers<[1], [0], [0], [1], [0, 0, 1, 1], [], []>} : vector<128x2xf32>, vector<2x4xf32>, vector<128x4xf32> -> vector<128x4xf32>
    %c0_29 = arith.constant 0 : index
    %c0_30 = arith.constant 0 : index
    %47 = vector.load %arg10[%c0_29, %c0_30] : memref<128x4xf32, #tpu.memory_space<vmem>>, vector<128x4xf32>
    tpu.vector_store %arg10[%c0_29, %c0_30], %46 {strides = array<i32>} : memref<128x4xf32, #tpu.memory_space<vmem>>, vector<128x4xf32>,
    %48 = vector.extract_strided_slice %41 {offsets = [0, 8, 0], sizes = [8, 16, 2], strides = [1, 1, 1]} : vector<10x25x2xf32> to vector<8x16x2xf32>
    %49 = vector.shape_cast %48 : vector<8x16x2xf32> to vector<128x2xf32>
    %c1_31 = arith.constant 1 : index
    %c0_32 = arith.constant 0 : index
    %c0_33 = arith.constant 0 : index
    %50 = vector.load %arg5[%c1_31, %c0_32, %c0_33] : memref<9x2x4xf32, #tpu.memory_space<vmem>>, vector<1x2x4xf32>
    %51 = vector.shape_cast %50 : vector<1x2x4xf32> to vector<2x4xf32>
    %cst_34 = arith.constant dense<0.000000e+00> : vector<128x4xf32>
    %52 = tpu.matmul %49, %51, %cst_34 {dimension_numbers = #tpu.dot_dimension_numbers<[1], [0], [0], [1], [0, 0, 1, 1], [], []>} : vector<128x2xf32>, vector<2x4xf32>, vector<128x4xf32> -> vector<128x4xf32>
    %c0_35 = arith.constant 0 : index
    %c0_36 = arith.constant 0 : index
    %53 = vector.load %arg10[%c0_35, %c0_36] : memref<128x4xf32, #tpu.memory_space<vmem>>, vector<128x4xf32>
    %54 = arith.addf %53, %52 : vector<128x4xf32>
    %c0_37 = arith.constant 0 : index
    %c0_38 = arith.constant 0 : index
    %55 = vector.load %arg10[%c0_37, %c0_38] : memref<128x4xf32, #tpu.memory_space<vmem>>, vector<128x4xf32>
    tpu.vector_store %arg10[%c0_37, %c0_38], %54 {strides = array<i32>} : memref<128x4xf32, #tpu.memory_space<vmem>>, vector<128x4xf32>,
    %56 = vector.extract_strided_slice %41 {offsets = [0, 9, 0], sizes = [8, 16, 2], strides = [1, 1, 1]} : vector<10x25x2xf32> to vector<8x16x2xf32>
    %57 = vector.shape_cast %56 : vector<8x16x2xf32> to vector<128x2xf32>
    %c2 = arith.constant 2 : index
    %c0_39 = arith.constant 0 : index
    %c0_40 = arith.constant 0 : index
    %58 = vector.load %arg5[%c2, %c0_39, %c0_40] : memref<9x2x4xf32, #tpu.memory_space<vmem>>, vector<1x2x4xf32>
    %59 = vector.shape_cast %58 : vector<1x2x4xf32> to vector<2x4xf32>
    %cst_41 = arith.constant dense<0.000000e+00> : vector<128x4xf32>
    %60 = tpu.matmul %57, %59, %cst_41 {dimension_numbers = #tpu.dot_dimension_numbers<[1], [0], [0], [1], [0, 0, 1, 1], [], []>} : vector<128x2xf32>, vector<2x4xf32>, vector<128x4xf32> -> vector<128x4xf32>
    %c0_42 = arith.constant 0 : index
    %c0_43 = arith.constant 0 : index
    %61 = vector.load %arg10[%c0_42, %c0_43] : memref<128x4xf32, #tpu.memory_space<vmem>>, vector<128x4xf32>
    %62 = arith.addf %61, %60 : vector<128x4xf32>
    %c0_44 = arith.constant 0 : index
    %c0_45 = arith.constant 0 : index
    %63 = vector.load %arg10[%c0_44, %c0_45] : memref<128x4xf32, #tpu.memory_space<vmem>>, vector<128x4xf32>
    tpu.vector_store %arg10[%c0_44, %c0_45], %62 {strides = array<i32>} : memref<128x4xf32, #tpu.memory_space<vmem>>, vector<128x4xf32>,
    %64 = vector.extract_strided_slice %41 {offsets = [1, 7, 0], sizes = [8, 16, 2], strides = [1, 1, 1]} : vector<10x25x2xf32> to vector<8x16x2xf32>
    %65 = vector.shape_cast %64 : vector<8x16x2xf32> to vector<128x2xf32>
    %c3 = arith.constant 3 : index
    %c0_46 = arith.constant 0 : index
    %c0_47 = arith.constant 0 : index
    %66 = vector.load %arg5[%c3, %c0_46, %c0_47] : memref<9x2x4xf32, #tpu.memory_space<vmem>>, vector<1x2x4xf32>
    %67 = vector.shape_cast %66 : vector<1x2x4xf32> to vector<2x4xf32>
    %cst_48 = arith.constant dense<0.000000e+00> : vector<128x4xf32>
    %68 = tpu.matmul %65, %67, %cst_48 {dimension_numbers = #tpu.dot_dimension_numbers<[1], [0], [0], [1], [0, 0, 1, 1], [], []>} : vector<128x2xf32>, vector<2x4xf32>, vector<128x4xf32> -> vector<128x4xf32>
    %c0_49 = arith.constant 0 : index
    %c0_50 = arith.constant 0 : index
    %69 = vector.load %arg10[%c0_49, %c0_50] : memref<128x4xf32, #tpu.memory_space<vmem>>, vector<128x4xf32>
    %70 = arith.addf %69, %68 : vector<128x4xf32>
    %c0_51 = arith.constant 0 : index
    %c0_52 = arith.constant 0 : index
    %71 = vector.load %arg10[%c0_51, %c0_52] : memref<128x4xf32, #tpu.memory_space<vmem>>, vector<128x4xf32>
    tpu.vector_store %arg10[%c0_51, %c0_52], %70 {strides = array<i32>} : memref<128x4xf32, #tpu.memory_space<vmem>>, vector<128x4xf32>,
    %72 = vector.extract_strided_slice %41 {offsets = [1, 8, 0], sizes = [8, 16, 2], strides = [1, 1, 1]} : vector<10x25x2xf32> to vector<8x16x2xf32>
    %73 = vector.shape_cast %72 : vector<8x16x2xf32> to vector<128x2xf32>
    %c4 = arith.constant 4 : index
    %c0_53 = arith.constant 0 : index
    %c0_54 = arith.constant 0 : index
    %74 = vector.load %arg5[%c4, %c0_53, %c0_54] : memref<9x2x4xf32, #tpu.memory_space<vmem>>, vector<1x2x4xf32>
    %75 = vector.shape_cast %74 : vector<1x2x4xf32> to vector<2x4xf32>
    %cst_55 = arith.constant dense<0.000000e+00> : vector<128x4xf32>
    %76 = tpu.matmul %73, %75, %cst_55 {dimension_numbers = #tpu.dot_dimension_numbers<[1], [0], [0], [1], [0, 0, 1, 1], [], []>} : vector<128x2xf32>, vector<2x4xf32>, vector<128x4xf32> -> vector<128x4xf32>
    %c0_56 = arith.constant 0 : index
    %c0_57 = arith.constant 0 : index
    %77 = vector.load %arg10[%c0_56, %c0_57] : memref<128x4xf32, #tpu.memory_space<vmem>>, vector<128x4xf32>
    %78 = arith.addf %77, %76 : vector<128x4xf32>
    %c0_58 = arith.constant 0 : index
    %c0_59 = arith.constant 0 : index
    %79 = vector.load %arg10[%c0_58, %c0_59] : memref<128x4xf32, #tpu.memory_space<vmem>>, vector<128x4xf32>
    tpu.vector_store %arg10[%c0_58, %c0_59], %78 {strides = array<i32>} : memref<128x4xf32, #tpu.memory_space<vmem>>, vector<128x4xf32>,
    %80 = vector.extract_strided_slice %41 {offsets = [1, 9, 0], sizes = [8, 16, 2], strides = [1, 1, 1]} : vector<10x25x2xf32> to vector<8x16x2xf32>
    %81 = vector.shape_cast %80 : vector<8x16x2xf32> to vector<128x2xf32>
    %c5 = arith.constant 5 : index
    %c0_60 = arith.constant 0 : index
    %c0_61 = arith.constant 0 : index
    %82 = vector.load %arg5[%c5, %c0_60, %c0_61] : memref<9x2x4xf32, #tpu.memory_space<vmem>>, vector<1x2x4xf32>
    %83 = vector.shape_cast %82 : vector<1x2x4xf32> to vector<2x4xf32>
    %cst_62 = arith.constant dense<0.000000e+00> : vector<128x4xf32>
    %84 = tpu.matmul %81, %83, %cst_62 {dimension_numbers = #tpu.dot_dimension_numbers<[1], [0], [0], [1], [0, 0, 1, 1], [], []>} : vector<128x2xf32>, vector<2x4xf32>, vector<128x4xf32> -> vector<128x4xf32>
    %c0_63 = arith.constant 0 : index
    %c0_64 = arith.constant 0 : index
    %85 = vector.load %arg10[%c0_63, %c0_64] : memref<128x4xf32, #tpu.memory_space<vmem>>, vector<128x4xf32>
    %86 = arith.addf %85, %84 : vector<128x4xf32>
    %c0_65 = arith.constant 0 : index
    %c0_66 = arith.constant 0 : index
    %87 = vector.load %arg10[%c0_65, %c0_66] : memref<128x4xf32, #tpu.memory_space<vmem>>, vector<128x4xf32>
    tpu.vector_store %arg10[%c0_65, %c0_66], %86 {strides = array<i32>} : memref<128x4xf32, #tpu.memory_space<vmem>>, vector<128x4xf32>,
    %88 = vector.extract_strided_slice %41 {offsets = [2, 7, 0], sizes = [8, 16, 2], strides = [1, 1, 1]} : vector<10x25x2xf32> to vector<8x16x2xf32>
    %89 = vector.shape_cast %88 : vector<8x16x2xf32> to vector<128x2xf32>
    %c6 = arith.constant 6 : index
    %c0_67 = arith.constant 0 : index
    %c0_68 = arith.constant 0 : index
    %90 = vector.load %arg5[%c6, %c0_67, %c0_68] : memref<9x2x4xf32, #tpu.memory_space<vmem>>, vector<1x2x4xf32>
    %91 = vector.shape_cast %90 : vector<1x2x4xf32> to vector<2x4xf32>
    %cst_69 = arith.constant dense<0.000000e+00> : vector<128x4xf32>
    %92 = tpu.matmul %89, %91, %cst_69 {dimension_numbers = #tpu.dot_dimension_numbers<[1], [0], [0], [1], [0, 0, 1, 1], [], []>} : vector<128x2xf32>, vector<2x4xf32>, vector<128x4xf32> -> vector<128x4xf32>
    %c0_70 = arith.constant 0 : index
    %c0_71 = arith.constant 0 : index
    %93 = vector.load %arg10[%c0_70, %c0_71] : memref<128x4xf32, #tpu.memory_space<vmem>>, vector<128x4xf32>
    %94 = arith.addf %93, %92 : vector<128x4xf32>
    %c0_72 = arith.constant 0 : index
    %c0_73 = arith.constant 0 : index
    %95 = vector.load %arg10[%c0_72, %c0_73] : memref<128x4xf32, #tpu.memory_space<vmem>>, vector<128x4xf32>
    tpu.vector_store %arg10[%c0_72, %c0_73], %94 {strides = array<i32>} : memref<128x4xf32, #tpu.memory_space<vmem>>, vector<128x4xf32>,
    %96 = vector.extract_strided_slice %41 {offsets = [2, 8, 0], sizes = [8, 16, 2], strides = [1, 1, 1]} : vector<10x25x2xf32> to vector<8x16x2xf32>
    %97 = vector.shape_cast %96 : vector<8x16x2xf32> to vector<128x2xf32>
    %c7 = arith.constant 7 : index
    %c0_74 = arith.constant 0 : index
    %c0_75 = arith.constant 0 : index
    %98 = vector.load %arg5[%c7, %c0_74, %c0_75] : memref<9x2x4xf32, #tpu.memory_space<vmem>>, vector<1x2x4xf32>
    %99 = vector.shape_cast %98 : vector<1x2x4xf32> to vector<2x4xf32>
    %cst_76 = arith.constant dense<0.000000e+00> : vector<128x4xf32>
    %100 = tpu.matmul %97, %99, %cst_76 {dimension_numbers = #tpu.dot_dimension_numbers<[1], [0], [0], [1], [0, 0, 1, 1], [], []>} : vector<128x2xf32>, vector<2x4xf32>, vector<128x4xf32> -> vector<128x4xf32>
    %c0_77 = arith.constant 0 : index
    %c0_78 = arith.constant 0 : index
    %101 = vector.load %arg10[%c0_77, %c0_78] : memref<128x4xf32, #tpu.memory_space<vmem>>, vector<128x4xf32>
    %102 = arith.addf %101, %100 : vector<128x4xf32>
    %c0_79 = arith.constant 0 : index
    %c0_80 = arith.constant 0 : index
    %103 = vector.load %arg10[%c0_79, %c0_80] : memref<128x4xf32, #tpu.memory_space<vmem>>, vector<128x4xf32>
    tpu.vector_store %arg10[%c0_79, %c0_80], %102 {strides = array<i32>} : memref<128x4xf32, #tpu.memory_space<vmem>>, vector<128x4xf32>,
    %104 = vector.extract_strided_slice %41 {offsets = [2, 9, 0], sizes = [8, 16, 2], strides = [1, 1, 1]} : vector<10x25x2xf32> to vector<8x16x2xf32>
    %105 = vector.shape_cast %104 : vector<8x16x2xf32> to vector<128x2xf32>
    %c8_81 = arith.constant 8 : index
    %c0_82 = arith.constant 0 : index
    %c0_83 = arith.constant 0 : index
    %106 = vector.load %arg5[%c8_81, %c0_82, %c0_83] : memref<9x2x4xf32, #tpu.memory_space<vmem>>, vector<1x2x4xf32>
    %107 = vector.shape_cast %106 : vector<1x2x4xf32> to vector<2x4xf32>
    %cst_84 = arith.constant dense<0.000000e+00> : vector<128x4xf32>
    %108 = tpu.matmul %105, %107, %cst_84 {dimension_numbers = #tpu.dot_dimension_numbers<[1], [0], [0], [1], [0, 0, 1, 1], [], []>} : vector<128x2xf32>, vector<2x4xf32>, vector<128x4xf32> -> vector<128x4xf32>
    %c0_85 = arith.constant 0 : index
    %c0_86 = arith.constant 0 : index
    %109 = vector.load %arg10[%c0_85, %c0_86] : memref<128x4xf32, #tpu.memory_space<vmem>>, vector<128x4xf32>
    %110 = arith.addf %109, %108 : vector<128x4xf32>
    %c0_87 = arith.constant 0 : index
    %c0_88 = arith.constant 0 : index
    %111 = vector.load %arg10[%c0_87, %c0_88] : memref<128x4xf32, #tpu.memory_space<vmem>>, vector<128x4xf32>
    tpu.vector_store %arg10[%c0_87, %c0_88], %110 {strides = array<i32>} : memref<128x4xf32, #tpu.memory_space<vmem>>, vector<128x4xf32>,
    %c0_89 = arith.constant 0 : index
    %c0_90 = arith.constant 0 : index
    %112 = vector.load %arg10[%c0_89, %c0_90] : memref<128x4xf32, #tpu.memory_space<vmem>>, vector<128x4xf32>
    %c0_91 = arith.constant 0 : index
    %c0_92 = arith.constant 0 : index
    %113 = vector.load %arg7[%c0_91, %c0_92] : memref<2x4xf32, #tpu.memory_space<vmem>>, vector<1x4xf32>
    %114 = vector.broadcast %113 : vector<1x4xf32> to vector<128x4xf32>
    %115 = arith.mulf %112, %114 : vector<128x4xf32>
    %c1_93 = arith.constant 1 : index
    %c0_94 = arith.constant 0 : index
    %116 = vector.load %arg7[%c1_93, %c0_94] : memref<2x4xf32, #tpu.memory_space<vmem>>, vector<1x4xf32>
    %117 = vector.broadcast %116 : vector<1x4xf32> to vector<128x4xf32>
    %118 = arith.addf %115, %117 : vector<128x4xf32>
    %cst_95 = arith.constant 0.000000e+00 : f32
    %119 = vector.broadcast %cst_95 : f32 to vector<128x4xf32>
    %120 = arith.cmpf ogt, %118, %119 : vector<128x4xf32>
    %cst_96 = arith.constant 1.000000e-01 : f32
    %121 = vector.broadcast %cst_96 : f32 to vector<128x4xf32>
    %122 = arith.mulf %121, %118 : vector<128x4xf32>
    %123 = arith.select %120, %118, %122 : vector<128x4xi1>, vector<128x4xf32>
    %124 = vector.shape_cast %1 : vector<8x16x4xf32> to vector<128x4xf32>
    %125 = arith.addf %123, %124 : vector<128x4xf32>
    %126 = vector.shape_cast %125 : vector<128x4xf32> to vector<1x8x16x4xf32>
    %c0_97 = arith.constant 0 : index
    %c0_98 = arith.constant 0 : index
    %c0_99 = arith.constant 0 : index
    %c0_100 = arith.constant 0 : index
    %127 = vector.load %arg8[%c0_97, %c0_98, %c0_99, %c0_100] : memref<1x8x16x4xf32, #tpu.memory_space<vmem>>, vector<1x8x16x4xf32>
    tpu.vector_store %arg8[%c0_97, %c0_98, %c0_99, %c0_100], %126 {strides = array<i32>} : memref<1x8x16x4xf32, #tpu.memory_space<vmem>>, vector<1x8x16x4xf32>,
    return
  }
  func.func @transform_0(%arg0: i32, %arg1: i32) -> (i32, i32, i32, i32) {
    %c0_i32 = arith.constant 0 : i32
    %c0_i32_0 = arith.constant 0 : i32
    %c0_i32_1 = arith.constant 0 : i32
    return %arg0, %arg1, %c0_i32, %c0_i32_0 : i32, i32, i32, i32
  }
  func.func @transform_1(%arg0: i32, %arg1: i32) -> (i32, i32, i32, i32) {
    %c2_i32 = arith.constant 2 : i32
    %0 = arith.muli %arg0, %c2_i32 : i32
    %1 = arith.addi %0, %arg1 : i32
    %c0_i32 = arith.constant 0 : i32
    %c0_i32_0 = arith.constant 0 : i32
    %c0_i32_1 = arith.constant 0 : i32
    %c0_i32_2 = arith.constant 0 : i32
    return %1, %c0_i32, %c0_i32_0, %c0_i32_1 : i32, i32, i32, i32
  }
  func.func @transform_2(%arg0: i32, %arg1: i32) -> (i32, i32) {
    %c0_i32 = arith.constant 0 : i32
    %c0_i32_0 = arith.constant 0 : i32
    %c0_i32_1 = arith.constant 0 : i32
    return %c0_i32, %c0_i32_0 : i32, i32
  }
  func.func @transform_3(%arg0: i32, %arg1: i32) -> (i32, i32, i32) {
    %c0_i32 = arith.constant 0 : i32
    %c0_i32_0 = arith.constant 0 : i32
    %c0_i32_1 = arith.constant 0 : i32
    %c0_i32_2 = arith.constant 0 : i32
    return %c0_i32, %c0_i32_0, %c0_i32_1 : i32, i32, i32
  }
  func.func @transform_4(%arg0: i32, %arg1: i32) -> (i32, i32) {
    %c0_i32 = arith.constant 0 : i32
    %c0_i32_0 = arith.constant 0 : i32
    %c0_i32_1 = arith.constant 0 : i32
    return %c0_i32, %c0_i32_0 : i32, i32
  }
  func.func @transform_5(%arg0: i32, %arg1: i32) -> (i32, i32) {
    %c0_i32 = arith.constant 0 : i32
    %c0_i32_0 = arith.constant 0 : i32
    %c0_i32_1 = arith.constant 0 : i32
    return %c0_i32, %c0_i32_0 : i32, i32
  }
  func.func @transform_6(%arg0: i32, %arg1: i32) -> (i32, i32, i32, i32) {
    %c0_i32 = arith.constant 0 : i32
    %c0_i32_0 = arith.constant 0 : i32
    %c0_i32_1 = arith.constant 0 : i32
    return %arg0, %arg1, %c0_i32, %c0_i32_0 : i32, i32, i32, i32
  }
}

</mosaic_0001>

<bundles_post_ra>
// kernel: res_block.1
= control target key start
LH: loop header
LB: loop body
LE: loop exit
PB: predicated region body
PF: predicated region fallthrough
CT: control target
= control target key end

     0   :  { %s3868_s21 = smov 0   ;;  %s3870_s22 = smov 0   ;;  %s5063_s0 = inlined_call_operand.vmem [shape: f32[2,16,16,4], index: 0, kind: input, shape index: {}]   ;;  %s5064_s1 = inlined_call_operand.vmem [shape: f32[4,2,16,4], index: 1, kind: input, shape index: {}]   ;;  %s5065_s2 = inlined_call_operand.vmem [shape: f32[4,2], index: 2, kind: input, shape index: {}]   ;;  %s5066_s3 = inlined_call_operand.vmem [shape: f32[9,2,4], index: 3, kind: input, shape index: {}]   ;;  %s5067_s4 = inlined_call_operand.vmem [shape: f32[2,2], index: 4, kind: input, shape index: {}]   ;;  %s5068_s5 = inlined_call_operand.vmem [shape: f32[2,4], index: 5, kind: input, shape index: {}]   ;;  %s5069_s6 = inlined_call_operand.vmem [shape: f32[2,16,16,4], index: 6, kind: output, shape index: {}]  }
   0x1   :  { %s3872_s23 = smov 0   ;;  %s3874_s24 = smov 0  }
   0x2   :  { %s3876_s25 = smov 0  }
   0x3 LB: > { %s25_s26 = sadd.s32 1, %s3822_s23  ;;  %s28_s27 = sadd.s32 1, %s3826_s24  ;;  %s3830_s25 = sphi %s3876_s25, %s16_s25   ;;  %s3826_s24 = sphi %s3874_s24, %s5077_s24   ;;  %s3822_s23 = sphi %s3872_s23, %s5076_s23   ;;  %s3818_s22 = sphi %s3870_s22, %s5075_s22   ;;  %s3814_s21 = sphi %s3868_s21, %s5074_s21  }
   0x4   : > { %p26_p0 = scmp.ge.s32.totalorder %s25_s26, 2  ;;  %p3092_p1 = scmp.ge.s32.totalorder %s3830_s25, 1 }
   0x5   : > { %p252_p2 = scmp.lt.s32.totalorder %s3830_s25, 5 }
   0x6   : > { %s5079_s26 = smov (%p26_p0, %s25_s26), 0  ;;  %s5081_s27 = smov (!%p26_p0, %s28_s27), %s3826_s24 }
   0x7   : > { %p253_p3 = pnand %p3092_p1, %p252_p2  ;;  %p30_p4 = scmp.ge.s32.totalorder %s5081_s27, 2 }
   0x8   : > { %s3097_s30 = sshll.u32 (!%p253_p3), %s3818_s22, 1  ;;  %s3093_s7 = sshll.u32 (!%p253_p3), %s3814_s21, 3 }
   0x9   : > { %s5083_s27 = smov (%p30_p4, %s5081_s27), 0  ;;  %256 = sbr.rel (%p253_p3) target bundleno = 621 (0x26d), region = 44 }
   0xa   : > { %s311_s8 = sadd.s32 (!%p253_p3), %s3814_s21, %s3097_s30  ;;  %p300_p5 = scmp.lt.s32.totalorder (!%p253_p3), %s3818_s22, 1 }
   0xb   : > { %p312_p6 = scmp.lt.s32.totalorder (!%p253_p3), %s311_s8, 3  ;;  %p302_p7 = scmp.lt.s32.totalorder (!%p253_p3), %s3093_s7, 15 }
   0xc   : > { %p691_p8 = scmp.ne.s32.totalorder (!%p253_p3), %s3814_s21, 0  ;;  %p695_p9 = scmp.ne.s32.totalorder (!%p253_p3), %s3814_s21, 1 }
   0xe   : > { %v350_v0 = vld [vmem:[%s5065_s2] sm:$0xf]  ;;  %vm412_vm0 = vcmask 1043456   ;;  %s5085_s22 = smov (!%p300_p5, %s3818_s22), 1  ;;  %s5087_s8 = smov (!%p312_p6, %s311_s8), 3  ;;  %vm351_vm1 = vcmask 31744  }
   0xf   : > { %3467 = vmatprep.subr.msk.mxu0 %vm412_vm0, %v350_v0  ;;  %3733 = vmatprep.subr.msk.mxu1 %vm412_vm0, %v350_v0  ;;  %s5089_s7 = smov (!%p302_p7, %s3093_s7), 15  ;;  %s3292_s9 = sshll.u32 %s5087_s8, 5  ;;  %vm723_vm2 = vcmask 15360   ;;  %v3832_v21 = vmov 0.0   ;;  %vm727_vm3 = vcmask 8192   ;;  %vm923_vm4 = vcmask 1041408  }
  0x10   : > { %3468 = vmatpush3.msk.msra.mxu0 %vm412_vm0, %v350_v0  ;;  %3734 = vmatpush3.msk.msra.mxu1 %vm412_vm0, %v350_v0  ;;  %s3095_s10 = sshll.u32 %s5085_s22, 5  ;;  %s316_s13 = scalar_lea.vmem %s5064_s1, %s3292_s9  ;;  %726 = vst.msk [vmem:[#allocation2 + $0x10] sm:$0xff] %vm723_vm2, %v3832_v21  ;;  %724 = vst.msk [vmem:[#allocation2] sm:$0xff] %vm723_vm2, %v3832_v21  ;;  %v890_v22 = vld [vmem:[%s5066_s3] sm:$0x3]  ;;  %vm1326_vm12 = vcmask 1046528  }
  0x11   : > { %s3094_s14 = sshll.u32 %s5089_s7, 1  ;;  %v346_v1 = vld [vmem:[%s316_s13] sm:$0xff]  ;;  %v347_v2 = vld [vmem:[%s316_s13 + $0x8] sm:$0xff]  ;;  %v348_v3 = vld [vmem:[%s316_s13 + $0x10] sm:$0xff]  ;;  %725 = vst.msk [vmem:[#allocation2 + $0x8] sm:$0xff] %vm723_vm2, %v3832_v21  ;;  %3499 = vmatprep.subr.msk.mxu1 %vm923_vm4, %v890_v22  ;;  %vm849_vm13 = vcmask 1040384  }
  0x12   : > { %s3908_s15 = sadd.s32 %s3095_s10, %s3094_s14  ;;  %3469 = vmatprep.mubr.msk.f32.mxu0 %vm351_vm1, %v346_v1  ;;  %3496 = vmatprep.mubr.msk.f32.mxu1 %vm351_vm1, %v348_v3  ;;  %v349_v4 = vld [vmem:[%s316_s13 + $0x18] sm:$0xff]  ;;  %729 = vst.msk [vmem:[#allocation2 + $0x20] sm:$0xff] %vm723_vm2, %v3832_v21  ;;  %730 = vst.msk [vmem:[#allocation2 + $0x28] sm:$0xff] %vm723_vm2, %v3832_v21  ;;  %v3162_v23 = vld [vmem:[%s5066_s3 + $0x4] sm:$0x3] }
  0x13   : > { %s3096_s16 = sshll.u32 %s3908_s15, 3  ;;  %3470 = vmatmul.mubr.msk.f32.vlgmr.msra.gmra.mxu0 %vm351_vm1, %v347_v2  ;;  %3497 = vmatmul.mubr.msk.f32.vlgmr.msra.gmra.mxu1 %vm351_vm1, %v349_v4  ;;  %731 = vst.msk [vmem:[#allocation2 + $0x30] sm:$0xff] %vm723_vm2, %v3832_v21  ;;  %733 = vst.msk [vmem:[#allocation2 + $0x40] sm:$0xff] %vm723_vm2, %v3832_v21  ;;  %v3997_v24 = vld [vmem:[%s5066_s3 + $0x2] sm:$0x3] }
  0x14   : > { %s3919_s19 = scalar_lea.vmem %s5063_s0, %s3096_s16  ;;  %734 = vst.msk [vmem:[#allocation2 + $0x48] sm:$0xff] %vm723_vm2, %v3832_v21  ;;  %735 = vst.msk [vmem:[#allocation2 + $0x50] sm:$0xff] %vm723_vm2, %v3832_v21  ;;  %3551 = vmatprep.subr.msk.mxu0 %vm923_vm4, %v3162_v23  ;;  %3500 = vmatpush3.msk.msra.mxu1 %vm923_vm4, %v890_v22  ;;  %v4004_v25 = vld [vmem:[%s5066_s3 + $0x8] sm:$0x3]  ;;  %v4013_v26 = vld [vmem:[%s5067_s4] ss:$0 sm:$0xff]  ;;  %s4955_s21 = scalar_lea.vmem %s5069_s6, %s3096_s16 }
  0x15   : > { %v330_v5 = vld [vmem:[%s3919_s19] sm:$0xff]  ;;  %v331_v6 = vld [vmem:[%s3919_s19 + $0x8] sm:$0xff]  ;;  %v332_v7 = vld [vmem:[%s3919_s19 + $0x10] sm:$0xff]  ;;  %737 = vst.msk [vmem:[#allocation2 + $0x60] sm:$0xff] %vm723_vm2, %v3832_v21  ;;  %3552 = vmatpush3.msk.msra.mxu0 %vm923_vm4, %v3162_v23  ;;  %3525 = vmatprep.subr.msk.mxu1 %vm923_vm4, %v3997_v24  ;;  %s692_s10 = scalar_select %p691_p8, 1, 0 }
  0x16   : > { %3472 = vmatprep.mubr.msk.f32.mxu0 %vm351_vm1, %v330_v5  ;;  %v333_v8 = vld [vmem:[%s3919_s19 + $0x18] sm:$0xff]  ;;  %v334_v9 = vld [vmem:[%s3919_s19 + $0x20] sm:$0xff]  ;;  %v335_v10 = vld [vmem:[%s3919_s19 + $0x28] sm:$0xff]  ;;  %738 = vst.msk [vmem:[#allocation2 + $0x68] sm:$0xff] %vm723_vm2, %v3832_v21  ;;  %3603 = vmatprep.subr.msk.mxu0 %vm923_vm4, %v4004_v25  ;;  %s696_s13 = scalar_select %p695_p9, 1, 0 }
  0x17   : > { %3473 = vmatmul.mubr.msk.f32.gmra.mxu0 %vm351_vm1, %v331_v6  ;;  %v336_v11 = vld [vmem:[%s3919_s19 + $0x30] sm:$0xff]  ;;  %v337_v12 = vld [vmem:[%s3919_s19 + $0x38] sm:$0xff]  ;;  %v338_v13 = vld [vmem:[%s3919_s19 + $0x40] sm:$0xff]  ;;  %739 = vst.msk [vmem:[#allocation2 + $0x70] sm:$0xff] %vm723_vm2, %v3832_v21  ;;  %v693_v31 = vstv %s692_s10 }
  0x18   : > { %3475 = vmatprep.mubr.msk.f32.mxu0 %vm351_vm1, %v332_v7  ;;  %v339_v14 = vld [vmem:[%s3919_s19 + $0x48] sm:$0xff]  ;;  %v340_v15 = vld [vmem:[%s3919_s19 + $0x50] sm:$0xff]  ;;  %v341_v16 = vld [vmem:[%s3919_s19 + $0x58] sm:$0xff]  ;;  %741 = vst.msk [vmem:[#allocation2 + $0x80] sm:$0xff] %vm723_vm2, %v3832_v21  ;;  %v697_v36 = vstv %s696_s13  ;;  %vm4030_vm5 = vcmp.eq.s32.totalorder %v693_v31, 1 }
  0x19   : > { %v342_v17 = vld [vmem:[%s3919_s19 + $0x60] sm:$0xff]  ;;  %v343_v18 = vld [vmem:[%s3919_s19 + $0x68] sm:$0xff]  ;;  %v344_v19 = vld [vmem:[%s3919_s19 + $0x70] sm:$0xff]  ;;  %742 = vst.msk [vmem:[#allocation2 + $0x88] sm:$0xff] %vm723_vm2, %v3832_v21  ;;  %vm4038_vm8 = vcmp.eq.s32.totalorder %v697_v36, 1 }
  0x1a   : > { %v345_v20 = vld [vmem:[%s3919_s19 + $0x78] sm:$0xff]  ;;  %743 = vst.msk [vmem:[#allocation2 + $0x90] sm:$0xff] %vm723_vm2, %v3832_v21  ;;  %745 = vst.msk [vmem:[#allocation2 + $0xa0] sm:$0xff] %vm723_vm2, %v3832_v21  ;;  %v4018_v28 = vld [vmem:[%s5067_s4 + $0x1] ss:$0 sm:$0xff] }
  0x1b   : > { %3476 = vmatmul.mubr.msk.f32.gmra.mxu0 %vm351_vm1, %v333_v8  ;;  %746 = vst.msk [vmem:[#allocation2 + $0xa8] sm:$0xff] %vm723_vm2, %v3832_v21  ;;  %747 = vst.msk [vmem:[#allocation2 + $0xb0] sm:$0xff] %vm723_vm2, %v3832_v21  ;;  %v4021_v32 = vld [vmem:[#allocation2] sm:$0xff] }
  0x1c   : > { %3478 = vmatprep.mubr.msk.f32.mxu0 %vm351_vm1, %v334_v9  ;;  %749 = vst.msk [vmem:[#allocation2 + $0xc0] sm:$0xff] %vm723_vm2, %v3832_v21  ;;  %750 = vst.msk [vmem:[#allocation2 + $0xc8] sm:$0xff] %vm723_vm2, %v3832_v21  ;;  %v850_v44 = vrot.slane %v4021_v32, 7  ;;  %v4047_v59 = vld [vmem:[#allocation2 + $0x20] sm:$0xff] }
  0x1d   : > { %751 = vst.msk [vmem:[#allocation2 + $0xd0] sm:$0xff] %vm723_vm2, %v3832_v21  ;;  %753 = vst.msk [vmem:[#allocation2 + $0xe0] sm:$0xff] %vm723_vm2, %v3832_v21  ;;  %v855_v9 = vrot.slane %v4047_v59, 7 }
  0x1e   : > { %754 = vst.msk [vmem:[#allocation2 + $0xe8] sm:$0xff] %vm723_vm2, %v3832_v21  ;;  %755 = vst.msk [vmem:[#allocation2 + $0xf0] sm:$0xff] %vm723_vm2, %v3832_v21 }
  0x1f   : > { %3479 = vmatmul.mubr.msk.f32.gmra.mxu0 %vm351_vm1, %v335_v10  ;;  %757 = vst.msk [vmem:[#allocation2 + $0x100] sm:$0xff] %vm723_vm2, %v3832_v21  ;;  %758 = vst.msk [vmem:[#allocation2 + $0x108] sm:$0xff] %vm723_vm2, %v3832_v21  ;;  %v4062_v10 = vld [vmem:[#allocation2 + $0x40] sm:$0xff] }
  0x20   : > { %3481 = vmatprep.mubr.msk.f32.mxu0 %vm351_vm1, %v336_v11  ;;  %759 = vst.msk [vmem:[#allocation2 + $0x110] sm:$0xff] %vm723_vm2, %v3832_v21  ;;  %761 = vst.msk [vmem:[#allocation2 + $0x120] sm:$0xff] %vm723_vm2, %v3832_v21 }
  0x21   : > { %762 = vst.msk [vmem:[#allocation2 + $0x128] sm:$0xff] %vm723_vm2, %v3832_v21  ;;  %763 = vst.msk [vmem:[#allocation2 + $0x130] sm:$0xff] %vm723_vm2, %v3832_v21 }
  0x22   : > { %728 = vst.msk [vmem:[#allocation2 + $0x18] sm:$0x1] %vm727_vm3, %v3832_v21  ;;  %732 = vst.msk [vmem:[#allocation2 + $0x38] sm:$0x1] %vm727_vm3, %v3832_v21 }
  0x23   : > { %3482 = vmatmul.mubr.msk.f32.gmra.mxu0 %vm351_vm1, %v337_v12  ;;  %736 = vst.msk [vmem:[#allocation2 + $0x58] sm:$0x1] %vm727_vm3, %v3832_v21  ;;  %740 = vst.msk [vmem:[#allocation2 + $0x78] sm:$0x1] %vm727_vm3, %v3832_v21 }
  0x24   : > { %3484 = vmatprep.mubr.msk.f32.mxu0 %vm351_vm1, %v338_v13  ;;  %744 = vst.msk [vmem:[#allocation2 + $0x98] sm:$0x1] %vm727_vm3, %v3832_v21  ;;  %748 = vst.msk [vmem:[#allocation2 + $0xb8] sm:$0x1] %vm727_vm3, %v3832_v21 }
  0x25   : > { %752 = vst.msk [vmem:[#allocation2 + $0xd8] sm:$0x1] %vm727_vm3, %v3832_v21  ;;  %756 = vst.msk [vmem:[#allocation2 + $0xf8] sm:$0x1] %vm727_vm3, %v3832_v21 }
  0x26   : > { %760 = vst.msk [vmem:[#allocation2 + $0x118] sm:$0x1] %vm727_vm3, %v3832_v21  ;;  %764 = vst.msk [vmem:[#allocation2 + $0x138] sm:$0x1] %vm727_vm3, %v3832_v21  ;;  %v4076_v21 = vld [vmem:[#allocation2 + $0x80] sm:$0xff] }
  0x27   : > { %3485 = vmatmul.mubr.msk.f32.gmra.mxu0 %vm351_vm1, %v339_v14  ;;  %v870_v42 = vrot.slane %v4076_v21, 7 }
  0x28   : > { %3487 = vmatprep.mubr.msk.f32.mxu0 %vm351_vm1, %v340_v15 }
  0x29   : > { %v4023_v33 = vld [vmem:[#allocation2 + $0x18] sm:$0x1] }
  0x2a   : > { %v1330_v45 = vrot.slane %v4023_v33, 1  ;;  %v4051_v0 = vld [vmem:[#allocation2 + $0x38] sm:$0x1] }
  0x2b   : > { %3488 = vmatmul.mubr.msk.f32.gmra.mxu0 %vm351_vm1, %v341_v16  ;;  %v4064_v11 = vld [vmem:[#allocation2 + $0x58] sm:$0x1]  ;;  %v1335_v14 = vrot.slane %v4051_v0, 1 }
  0x2c   : > { %3490 = vmatprep.mubr.msk.f32.mxu0 %vm351_vm1, %v342_v17  ;;  %v4069_v15 = vld [vmem:[#allocation2 + $0x78] sm:$0x1] }
  0x2d   : > { %v4084_v36 = vld [vmem:[#allocation2 + $0x98] sm:$0x1] }
  0x2f   : > { %3491 = vmatmul.mubr.msk.f32.gmra.mxu0 %vm351_vm1, %v343_v18 }
  0x30   : > { %3493 = vmatprep.mubr.msk.f32.mxu0 %vm351_vm1, %v344_v19 }
  0x33   : > { %3494 = vmatmul.mubr.msk.f32.gmra.mxu0 %vm351_vm1, %v345_v20  ;;  %v4074_v20 = vld [vmem:[#allocation2 + $0x60] sm:$0xff] }
  0xd3   : > { %v3471_v27 = vpop.f32.mrf.mxu0  ;;  %v3498_v29 = vpop.f32.mrf.mxu1 }
  0xd4   : > { %v587_v30 = vmul.f32 %v3471_v27, %v4013_v26  ;;  %v605_v34 = vmul.f32 %v3498_v29, %v4013_v26  ;;  %v860_v27 = vrot.slane %v4062_v10, 7  ;;  %v1340_v29 = vrot.slane %v4064_v11, 1 }
  0xd5   : > { %v482_v35 = vpop.f32.mrf.mxu0  ;;  %v572_v37 = vpop.f32.mrf.mxu1 }
  0xd6   : > { %v612_v38 = vadd.f32 %v4018_v28, %v587_v30  ;;  %v586_v39 = vmul.f32 %v4013_v26, %v482_v35  ;;  %v630_v40 = vadd.f32 %v4018_v28, %v605_v34  ;;  %v604_v41 = vmul.f32 %v4013_v26, %v572_v37 }
  0xd7   : > { %v3474_v43 = vpop.f32.mrf.mxu0 }
  0xd8   : > { %vm632_vm6 = vcmp.gt.f32.partialorder %v612_v38, 0.0  ;;  %v652_v46 = vmul.f32 0.1, %v612_v38  ;;  %v611_v47 = vadd.f32 %v4018_v28, %v586_v39  ;;  %v589_v48 = vmul.f32 %v3474_v43, %v4013_v26 }
  0xd9   : > { %v492_v49 = vpop.f32.mrf.mxu0  ;;  %vm650_vm7 = vcmp.gt.f32.partialorder %v630_v40, 0.0  ;;  %v670_v50 = vmul.f32 0.1, %v630_v40  ;;  %v629_v52 = vadd.f32 %v4018_v28, %v604_v41  ;;  %v1345_v41 = vrot.slane %v4069_v15, 1 }
  0xda   : > { %v672_v53 = vsel %vm632_vm6, %v612_v38, %v652_v46  ;;  %vm631_vm9 = vcmp.gt.f32.partialorder %v611_v47, 0.0  ;;  %v651_v54 = vmul.f32 0.1, %v611_v47  ;;  %v614_v55 = vadd.f32 %v4018_v28, %v589_v48 }
  0xdb   : > { %v704_v56 = vsel %vm4030_vm5, %v672_v53, 0.0  ;;  %v588_v57 = vmul.f32 %v4013_v26, %v492_v49  ;;  %v3477_v58 = vpop.f32.mrf.mxu0  ;;  %v690_v60 = vsel %vm650_vm7, %v630_v40, %v670_v50  ;;  %vm649_vm10 = vcmp.gt.f32.partialorder %v629_v52, 0.0 }
  0xdc   : > { %766 = vst.msk [vmem:[#allocation2 + $0x10] sm:$0xff] %vm723_vm2, %v704_v56  ;;  %v671_v61 = vsel %vm631_vm9, %v611_v47, %v651_v54  ;;  %vm634_vm11 = vcmp.gt.f32.partialorder %v614_v55, 0.0  ;;  %v654_v62 = vmul.f32 0.1, %v614_v55  ;;  %v591_v63 = vmul.f32 %v3477_v58, %v4013_v26 }
  0xdd   : > { %v703_v1 = vsel %vm4030_vm5, %v671_v61, 0.0  ;;  %v613_v2 = vadd.f32 %v4018_v28, %v588_v57  ;;  %v502_v3 = vpop.f32.mrf.mxu0  ;;  %v722_v4 = vsel %vm4038_vm8, %v690_v60, 0.0  ;;  %v669_v5 = vmul.f32 0.1, %v629_v52 }
  0xde   : > { %765 = vst.msk [vmem:[#allocation2 + $0x8] sm:$0xff] %vm723_vm2, %v703_v1  ;;  %v674_v6 = vsel %vm634_vm11, %v614_v55, %v654_v62  ;;  %v616_v7 = vadd.f32 %v4018_v28, %v591_v63  ;;  %v590_v8 = vmul.f32 %v4013_v26, %v502_v3  ;;  %784 = vst.msk [vmem:[#allocation2 + $0x130] sm:$0xff] %vm723_vm2, %v722_v4  ;;  %v865_v40 = vrot.slane %v4074_v20, 7 }
  0xdf   : > { %768 = vst.msk [vmem:[#allocation2 + $0x30] sm:$0xff] %vm723_vm2, %v674_v6  ;;  %vm633_vm14 = vcmp.gt.f32.partialorder %v613_v2, 0.0  ;;  %v653_v12 = vmul.f32 0.1, %v613_v2  ;;  %v3480_v13 = vpop.f32.mrf.mxu0  ;;  %v689_v16 = vsel %vm649_vm10, %v629_v52, %v669_v5  ;;  %v1350_v53 = vrot.slane %v4084_v36, 1 }
  0xe0   : > { %vm636_vm15 = vcmp.gt.f32.partialorder %v616_v7, 0.0  ;;  %v656_v17 = vmul.f32 0.1, %v616_v7  ;;  %v615_v18 = vadd.f32 %v4018_v28, %v590_v8  ;;  %v593_v19 = vmul.f32 %v3480_v13, %v4013_v26 }
  0xe1   : > { %v673_v22 = vsel %vm633_vm14, %v613_v2, %v653_v12  ;;  %v512_v23 = vpop.f32.mrf.mxu0  ;;  %v721_v30 = vsel %vm4038_vm8, %v689_v16, 0.0 }
  0xe2   : > { %767 = vst.msk [vmem:[#allocation2 + $0x28] sm:$0xff] %vm723_vm2, %v673_v22  ;;  %v676_v31 = vsel %vm636_vm15, %v616_v7, %v656_v17  ;;  %vm635_vm0 = vcmp.gt.f32.partialorder %v615_v18, 0.0  ;;  %v655_v34 = vmul.f32 0.1, %v615_v18  ;;  %v618_v35 = vadd.f32 %v4018_v28, %v593_v19  ;;  %783 = vst.msk [vmem:[#allocation2 + $0x128] sm:$0xff] %vm723_vm2, %v721_v30 }
  0xe3   : > { %770 = vst.msk [vmem:[#allocation2 + $0x50] sm:$0xff] %vm723_vm2, %v676_v31  ;;  %v592_v37 = vmul.f32 %v4013_v26, %v512_v23  ;;  %v3483_v38 = vpop.f32.mrf.mxu0  ;;  %v4089_v39 = vld [vmem:[#allocation2 + $0x10] sm:$0xff] }
  0xe4   : > { %v675_v43 = vsel %vm635_vm0, %v615_v18, %v655_v34  ;;  %vm638_vm3 = vcmp.gt.f32.partialorder %v618_v35, 0.0  ;;  %v658_v46 = vmul.f32 0.1, %v618_v35  ;;  %v595_v47 = vmul.f32 %v3483_v38, %v4013_v26 }
  0xe5   : > { %769 = vst.msk [vmem:[#allocation2 + $0x48] sm:$0xff] %vm723_vm2, %v675_v43  ;;  %v617_v48 = vadd.f32 %v4018_v28, %v592_v37  ;;  %v522_v49 = vpop.f32.mrf.mxu0  ;;  %v4097_v50 = vld [vmem:[#allocation2 + $0x8] sm:$0xff]  ;;  %v1328_v51 = vrot.slane %v4089_v39, 1  ;;  %v853_v52 = vrot.slane %v4089_v39, 7 }
  0xe6   : > { %v678_v54 = vsel %vm638_vm3, %v618_v35, %v658_v46  ;;  %v620_v55 = vadd.f32 %v4018_v28, %v595_v47  ;;  %v594_v56 = vmul.f32 %v4013_v26, %v522_v49  ;;  %v851_v57 = vrot.slane %v4097_v50, 7  ;;  %v4112_v3 = vld [vmem:[#allocation2 + $0x30] sm:$0xff] }
  0xe7   : > { %772 = vst.msk [vmem:[#allocation2 + $0x70] sm:$0xff] %vm723_vm2, %v678_v54  ;;  %vm637_vm5 = vcmp.gt.f32.partialorder %v617_v48, 0.0  ;;  %v657_v58 = vmul.f32 0.1, %v617_v48  ;;  %v3486_v60 = vpop.f32.mrf.mxu0  ;;  %v1327_v61 = vrot.slane %v4097_v50, 1  ;;  %v1331_v62 = vsel %vm1326_vm12, %v1328_v51, %v1330_v45 }
  0xe8   : > { %vm640_vm6 = vcmp.gt.f32.partialorder %v620_v55, 0.0  ;;  %v660_v63 = vmul.f32 0.1, %v620_v55  ;;  %v619_v1 = vadd.f32 %v4018_v28, %v594_v56  ;;  %v597_v2 = vmul.f32 %v3486_v60, %v4013_v26  ;;  %v4124_v45 = vld [vmem:[%s5066_s3 + $0x6] sm:$0x3] }
  0xe9   : > { %v677_v4 = vsel %vm637_vm5, %v617_v48, %v657_v58  ;;  %v532_v5 = vpop.f32.mrf.mxu0  ;;  %v852_v6 = vsel %vm849_vm13, %v850_v44, %v851_v57  ;;  %v1329_v7 = vsel %vm1326_vm12, %v1327_v61, %v1328_v51  ;;  %v854_v33 = vsel %vm849_vm13, %v851_v57, %v853_v52  ;;  %v4119_v8 = vld [vmem:[#allocation2 + $0x28] sm:$0xff] }
  0xea   : > { %771 = vst.msk [vmem:[#allocation2 + $0x68] sm:$0xff] %vm723_vm2, %v677_v4  ;;  %v680_v12 = vsel %vm640_vm6, %v620_v55, %v660_v63  ;;  %vm639_vm7 = vcmp.gt.f32.partialorder %v619_v1, 0.0  ;;  %v659_v13 = vmul.f32 0.1, %v619_v1  ;;  %v622_v32 = vadd.f32 %v4018_v28, %v597_v2  ;;  %3501 = vmatprep.mubr.msk.f32.mxu1 %vm723_vm2, %v852_v6  ;;  %3553 = vmatprep.mubr.msk.f32.mxu0 %vm723_vm2, %v1329_v7  ;;  %v4133_v44 = vld [vmem:[%s5066_s3 + $0xc] sm:$0x3] }
  0xeb   : > { %774 = vst.msk [vmem:[#allocation2 + $0x90] sm:$0xff] %vm723_vm2, %v680_v12  ;;  %v596_v16 = vmul.f32 %v4013_v26, %v532_v5  ;;  %3502 = vmatmul.mubr.msk.f32.vlgmr.msra.gmra.mxu1 %vm723_vm2, %v854_v33  ;;  %3554 = vmatmul.mubr.msk.f32.vlgmr.msra.gmra.mxu0 %vm723_vm2, %v1331_v62  ;;  %v3489_v17 = vpop.f32.mrf.mxu0  ;;  %v856_v18 = vrot.slane %v4119_v8, 7  ;;  %v1332_v19 = vrot.slane %v4119_v8, 1  ;;  %v1333_v22 = vrot.slane %v4112_v3, 1  ;;  %v4171_v47 = vld [vmem:[#allocation2 + $0x50] sm:$0xff]  ;;  %v805_v6 = vld [vmem:[#allocation2 + $0xa0] sm:$0xff] }
  0xec   : > { %v679_v23 = vsel %vm639_vm7, %v619_v1, %v659_v13  ;;  %vm642_vm8 = vcmp.gt.f32.partialorder %v622_v32, 0.0  ;;  %v662_v30 = vmul.f32 0.1, %v622_v32  ;;  %3526 = vmatpush3.msk.msra.mxu1 %vm923_vm4, %v3997_v24  ;;  %v599_v31 = vmul.f32 %v3489_v17, %v4013_v26  ;;  %v4145_v34 = vld [vmem:[#allocation2 + $0x48] sm:$0xff]  ;;  %3604 = vmatpush3.msk.msra.mxu0 %vm923_vm4, %v4004_v25 }
  0xed   : > { %773 = vst.msk [vmem:[#allocation2 + $0x88] sm:$0xff] %vm723_vm2, %v679_v23  ;;  %v621_v35 = vadd.f32 %v4018_v28, %v596_v16  ;;  %v4154_v37 = vsel %vm849_vm13, %v855_v9, %v856_v18  ;;  %v4157_v38 = vsel %vm1326_vm12, %v1332_v19, %v1333_v22  ;;  %v542_v24 = vpop.f32.mrf.mxu0  ;;  %v858_v43 = vrot.slane %v4112_v3, 7  ;;  %3577 = vmatprep.subr.msk.mxu1 %vm923_vm4, %v4124_v45 }
  0xee   : > { %3655 = vmatprep.subr.msk.mxu0 %vm923_vm4, %v4133_v44  ;;  %v682_v25 = vsel %vm642_vm8, %v622_v32, %v662_v30  ;;  %v624_v46 = vadd.f32 %v4018_v28, %v599_v31  ;;  %3504 = vmatprep.mubr.msk.f32.mxu1 %vm723_vm2, %v4154_v37  ;;  %v598_v59 = vmul.f32 %v4013_v26, %v542_v24  ;;  %v861_v9 = vrot.slane %v4145_v34, 7  ;;  %v4201_v10 = vld [vmem:[#allocation2 + $0x70] sm:$0xff] }
  0xef   : > { %3556 = vmatprep.mubr.msk.f32.mxu0 %vm723_vm2, %v4157_v38  ;;  %776 = vst.msk [vmem:[#allocation2 + $0xb0] sm:$0xff] %vm723_vm2, %v682_v25  ;;  %vm641_vm9 = vcmp.gt.f32.partialorder %v621_v35, 0.0  ;;  %v661_v48 = vmul.f32 0.1, %v621_v35  ;;  %v4175_v49 = vsel %vm849_vm13, %v856_v18, %v858_v43  ;;  %v4180_v51 = vsel %vm1326_vm12, %v1333_v22, %v1335_v14  ;;  %v3492_v52 = vpop.f32.mrf.mxu0 }
  0xf0   : > { %vm644_vm10 = vcmp.gt.f32.partialorder %v624_v46, 0.0  ;;  %v664_v54 = vmul.f32 0.1, %v624_v46  ;;  %v623_v55 = vadd.f32 %v4018_v28, %v598_v59  ;;  %3505 = vmatmul.mubr.msk.f32.gmra.mxu1 %vm723_vm2, %v4175_v49  ;;  %3557 = vmatmul.mubr.msk.f32.gmra.mxu0 %vm723_vm2, %v4180_v51  ;;  %v601_v56 = vmul.f32 %v3492_v52, %v4013_v26  ;;  %v808_v59 = vld [vmem:[#allocation2 + $0xb8] sm:$0x1] }
  0xf1   : > { %v681_v57 = vsel %vm641_vm9, %v621_v35, %v661_v48  ;;  %v4191_v0 = vsel %vm849_vm13, %v860_v27, %v861_v9  ;;  %v1337_v14 = vrot.slane %v4145_v34, 1  ;;  %v1338_v58 = vrot.slane %v4171_v47, 1  ;;  %v552_v60 = vpop.f32.mrf.mxu0  ;;  %v4195_v61 = vld [vmem:[#allocation2 + $0x68] sm:$0xff] }
  0xf2   : > { %775 = vst.msk [vmem:[#allocation2 + $0xa8] sm:$0xff] %vm723_vm2, %v681_v57  ;;  %v684_v62 = vsel %vm644_vm10, %v624_v46, %v664_v54  ;;  %vm643_vm11 = vcmp.gt.f32.partialorder %v623_v55, 0.0  ;;  %v663_v63 = vmul.f32 0.1, %v623_v55  ;;  %v626_v1 = vadd.f32 %v4018_v28, %v601_v56  ;;  %3507 = vmatprep.mubr.msk.f32.mxu1 %vm723_vm2, %v4191_v0  ;;  %v4228_v17 = vld [vmem:[#allocation2 + $0x90] sm:$0xff] }
  0xf3   : > { %778 = vst.msk [vmem:[#allocation2 + $0xd0] sm:$0xff] %vm723_vm2, %v684_v62  ;;  %v4205_v27 = vsel %vm1326_vm12, %v1337_v14, %v1338_v58  ;;  %v600_v2 = vmul.f32 %v4013_v26, %v552_v60  ;;  %v863_v4 = vrot.slane %v4171_v47, 7  ;;  %v4212_v5 = vsel %vm1326_vm12, %v1338_v58, %v1340_v29  ;;  %v3495_v30 = vpop.f32.mrf.mxu0  ;;  %v812_v62 = vld [vmem:[#allocation2 + $0xd8] sm:$0x1] }
  0xf4   : > { %v683_v7 = vsel %vm643_vm11, %v623_v55, %v663_v63  ;;  %vm646_vm14 = vcmp.gt.f32.partialorder %v626_v1, 0.0  ;;  %v666_v33 = vmul.f32 0.1, %v626_v1  ;;  %3559 = vmatprep.mubr.msk.f32.mxu0 %vm723_vm2, %v4205_v27  ;;  %v866_v12 = vrot.slane %v4195_v61, 7  ;;  %v4217_v13 = vld [vmem:[#allocation2 + $0x88] sm:$0xff] }
  0xf5   : > { %777 = vst.msk [vmem:[#allocation2 + $0xc8] sm:$0xff] %vm723_vm2, %v683_v7  ;;  %v625_v32 = vadd.f32 %v4018_v28, %v600_v2  ;;  %v4222_v11 = vsel %vm849_vm13, %v861_v9, %v863_v4  ;;  %3560 = vmatmul.mubr.msk.f32.gmra.mxu0 %vm723_vm2, %v4212_v5  ;;  %v1342_v29 = vrot.slane %v4195_v61, 1  ;;  %v1343_v16 = vrot.slane %v4201_v10, 1  ;;  %v809_v9 = vld [vmem:[#allocation2 + $0xc0] sm:$0xff]  ;;  %v562_v57 = vpop.f32.mrf.mxu0 }
  0xf6   : > { %v686_v18 = vsel %vm646_vm14, %v626_v1, %v666_v33  ;;  %3508 = vmatmul.mubr.msk.f32.gmra.mxu1 %vm723_vm2, %v4222_v11  ;;  %v4235_v19 = vsel %vm849_vm13, %v865_v40, %v866_v12  ;;  %v871_v22 = vrot.slane %v4217_v13, 7  ;;  %v875_v23 = vrot.slane %v805_v6, 7  ;;  %v4245_v20 = vld [vmem:[#allocation2 + $0xb0] sm:$0xff]  ;;  %v813_v6 = vld [vmem:[#allocation2 + $0xe0] sm:$0xff] }
  0xf7   : > { %780 = vst.msk [vmem:[#allocation2 + $0xf0] sm:$0xff] %vm723_vm2, %v686_v18  ;;  %vm645_vm15 = vcmp.gt.f32.partialorder %v625_v32, 0.0  ;;  %v665_v31 = vmul.f32 0.1, %v625_v32  ;;  %3510 = vmatprep.mubr.msk.f32.mxu1 %vm723_vm2, %v4235_v19  ;;  %v4242_v35 = vsel %vm1326_vm12, %v1342_v29, %v1343_v16  ;;  %v868_v24 = vrot.slane %v4201_v10, 7 }
  0xf8   : > { %3562 = vmatprep.mubr.msk.f32.mxu0 %vm723_vm2, %v4242_v35  ;;  %v4252_v40 = vsel %vm1326_vm12, %v1343_v16, %v1345_v41  ;;  %v4257_v43 = vsel %vm849_vm13, %v870_v42, %v871_v22  ;;  %v1347_v25 = vrot.slane %v4217_v13, 1  ;;  %v1348_v46 = vrot.slane %v4228_v17, 1 }
  0xf9   : > { %v685_v48 = vsel %vm645_vm15, %v625_v32, %v665_v31  ;;  %v4262_v52 = vsel %vm849_vm13, %v866_v12, %v868_v24  ;;  %3563 = vmatmul.mubr.msk.f32.gmra.mxu0 %vm723_vm2, %v4252_v40  ;;  %v873_v15 = vrot.slane %v4228_v17, 7  ;;  %v4267_v41 = vld [vmem:[#allocation2 + $0xa8] sm:$0xff]  ;;  %v1353_v55 = vrot.slane %v4245_v20, 1 }
  0xfa   : > { %779 = vst.msk [vmem:[#allocation2 + $0xe8] sm:$0xff] %vm723_vm2, %v685_v48  ;;  %3511 = vmatmul.mubr.msk.f32.gmra.mxu1 %vm723_vm2, %v4262_v52  ;;  %v4273_v21 = vsel %vm1326_vm12, %v1347_v25, %v1348_v46  ;;  %v876_v42 = vrot.slane %v4267_v41, 7  ;;  %v1352_v54 = vrot.slane %v4267_v41, 1  ;;  %v4278_v56 = vld [vmem:[#allocation2 + $0xd0] sm:$0xff]  ;;  %v4287_v14 = vsel %vm1326_vm12, %v1348_v46, %v1350_v53 }
  0xfb   : > { %3513 = vmatprep.mubr.msk.f32.mxu1 %vm723_vm2, %v4257_v43  ;;  %3565 = vmatprep.mubr.msk.f32.mxu0 %vm723_vm2, %v4273_v21  ;;  %v1355_v58 = vrot.slane %v808_v59, 1  ;;  %v880_v60 = vrot.slane %v809_v9, 7  ;;  %v4290_v63 = vsel %vm849_vm13, %v871_v22, %v873_v15  ;;  %v603_v36 = vmul.f32 %v3495_v30, %v4013_v26  ;;  %v816_v9 = vld [vmem:[#allocation2 + $0xf8] sm:$0x1] }
  0xfc   : > { %v4293_v1 = vsel %vm849_vm13, %v875_v23, %v876_v42  ;;  %v4296_v2 = vsel %vm1326_vm12, %v1352_v54, %v1353_v55  ;;  %v4298_v4 = vld [vmem:[#allocation2 + $0xc8] sm:$0xff]  ;;  %v1358_v33 = vrot.slane %v4278_v56, 1  ;;  %v602_v12 = vmul.f32 %v4013_v26, %v562_v57 }
  0xfd   : > { %3566 = vmatmul.mubr.msk.f32.gmra.mxu0 %vm723_vm2, %v4287_v14  ;;  %v881_v53 = vrot.slane %v4298_v4, 7  ;;  %v1357_v7 = vrot.slane %v4298_v4, 1  ;;  %v1360_v32 = vrot.slane %v812_v62, 1  ;;  %v628_v16 = vadd.f32 %v4018_v28, %v603_v36 }
  0xfe   : > { %3514 = vmatmul.mubr.msk.f32.gmra.mxu1 %vm723_vm2, %v4290_v63  ;;  %3568 = vmatprep.mubr.msk.f32.mxu0 %vm723_vm2, %v4296_v2  ;;  %v4311_v29 = vld [vmem:[#allocation2 + $0xf0] sm:$0xff]  ;;  %v878_v18 = vrot.slane %v4245_v20, 7  ;;  %v4318_v22 = vsel %vm1326_vm12, %v1353_v55, %v1355_v58  ;;  %v885_v23 = vrot.slane %v813_v6, 7  ;;  %v627_v24 = vadd.f32 %v4018_v28, %v602_v12 }
  0xff   : > { %3516 = vmatprep.mubr.msk.f32.mxu1 %vm723_vm2, %v4293_v1  ;;  %v4321_v26 = vsel %vm1326_vm12, %v1357_v7, %v1358_v33  ;;  %v4324_v30 = vsel %vm849_vm13, %v880_v60, %v881_v53  ;;  %vm648_vm0 = vcmp.gt.f32.partialorder %v628_v16, 0.0  ;;  %v668_v31 = vmul.f32 0.1, %v628_v16  ;;  %v3270_v12 = vld [vmem:[%s5066_s3 + $0x10] sm:$0x3] }
 0x100   : > { %v4328_v25 = vsel %vm849_vm13, %v876_v42, %v878_v18  ;;  %v1363_v59 = vrot.slane %v4311_v29, 1  ;;  %vm647_vm3 = vcmp.gt.f32.partialorder %v627_v24, 0.0  ;;  %v883_v42 = vrot.slane %v4278_v56, 7 }
 0x101   : > { %3569 = vmatmul.mubr.msk.f32.gmra.mxu0 %vm723_vm2, %v4318_v22  ;;  %v4332_v46 = vld [vmem:[#allocation2 + $0xe8] sm:$0xff]  ;;  %v688_v15 = vsel %vm648_vm0, %v628_v16, %v668_v31  ;;  %v667_v54 = vmul.f32 0.1, %v627_v24  ;;  %v4346_v55 = vsel %vm1326_vm12, %v1358_v33, %v1360_v32  ;;  %v1365_v60 = vrot.slane %v816_v9, 1 }
 0x102   : > { %3517 = vmatmul.mubr.msk.f32.gmra.mxu1 %vm723_vm2, %v4328_v25  ;;  %3571 = vmatprep.mubr.msk.f32.mxu0 %vm723_vm2, %v4321_v26  ;;  %v886_v48 = vrot.slane %v4332_v46, 7  ;;  %v1362_v28 = vrot.slane %v4332_v46, 1  ;;  %782 = vst.msk [vmem:[#allocation2 + $0x110] sm:$0xff] %vm723_vm2, %v688_v15  ;;  %v4355_v62 = vsel %vm849_vm13, %v881_v53, %v883_v42  ;;  %v888_v36 = vrot.slane %v4311_v29, 7  ;;  %v3216_v33 = vld [vmem:[%s5066_s3 + $0xa] sm:$0x3] }
 0x103   : > { %3519 = vmatprep.mubr.msk.f32.mxu1 %vm723_vm2, %v4324_v30  ;;  %v687_v6 = vsel %vm647_vm3, %v627_v24, %v667_v54  ;;  %v4368_v53 = vsel %vm1326_vm12, %v1363_v59, %v1365_v60 }
 0x104   : > { %v4349_v57 = vsel %vm849_vm13, %v885_v23, %v886_v48  ;;  %v4352_v58 = vsel %vm1326_vm12, %v1362_v28, %v1363_v59  ;;  %781 = vst.msk [vmem:[#allocation2 + $0x108] sm:$0xff] %vm723_vm2, %v687_v6  ;;  %v4371_v7 = vsel %vm849_vm13, %v886_v48, %v888_v36 }
 0x105   : > { %3572 = vmatmul.mubr.msk.f32.gmra.mxu0 %vm723_vm2, %v4346_v55 }
 0x106   : > { %3520 = vmatmul.mubr.msk.f32.gmra.mxu1 %vm723_vm2, %v4355_v62  ;;  %3574 = vmatprep.mubr.msk.f32.mxu0 %vm723_vm2, %v4352_v58 }
 0x107   : > { %3522 = vmatprep.mubr.msk.f32.mxu1 %vm723_vm2, %v4349_v57 }
 0x109   : > { %3575 = vmatmul.mubr.msk.f32.gmra.mxu0 %vm723_vm2, %v4368_v53 }
 0x10a   : > { %3523 = vmatmul.mubr.msk.f32.gmra.mxu1 %vm723_vm2, %v4371_v7  ;;  %3605 = vmatprep.mubr.msk.f32.mxu0 %vm723_vm2, %v4119_v8 }
 0x10b   : > { %3527 = vmatprep.mubr.msk.f32.mxu1 %vm723_vm2, %v4097_v50  ;;  %v4449_v50 = vld [vmem:[#allocation2 + $0x110] sm:$0xff] }
 0x10d   : > { %3606 = vmatmul.mubr.msk.f32.vlgmr.msra.gmra.mxu0 %vm723_vm2, %v4112_v3 }
 0x10e   : > { %3528 = vmatmul.mubr.msk.f32.vlgmr.msra.gmra.mxu1 %vm723_vm2, %v4089_v39  ;;  %3608 = vmatprep.mubr.msk.f32.mxu0 %vm723_vm2, %v4145_v34  ;;  %v4441_v39 = vld [vmem:[#allocation2 + $0x108] sm:$0xff] }
 0x10f   : > { %3578 = vmatpush3.msk.msra.mxu1 %vm923_vm4, %v4124_v45  ;;  %3530 = vmatprep.mubr.msk.f32.mxu1 %vm723_vm2, %v4119_v8  ;;  %v817_v8 = vld [vmem:[#allocation2 + $0x100] sm:$0xff]  ;;  %v1601_v45 = vrot.slane %v4441_v39, 7 }
 0x110   : > { %3629 = vmatprep.subr.msk.mxu1 %vm923_vm4, %v3216_v33  ;;  %3656 = vmatpush3.msk.msra.mxu0 %vm923_vm4, %v4133_v44  ;;  %v1600_v44 = vrot.slane %v817_v8, 7 }
 0x111   : > { %3609 = vmatmul.mubr.msk.f32.gmra.mxu0 %vm723_vm2, %v4171_v47  ;;  %3707 = vmatprep.subr.msk.mxu0 %vm923_vm4, %v3270_v12 }
 0x112   : > { %3531 = vmatmul.mubr.msk.f32.gmra.mxu1 %vm723_vm2, %v4112_v3  ;;  %3611 = vmatprep.mubr.msk.f32.mxu0 %vm723_vm2, %v4195_v61  ;;  %v3252_v3 = vld [vmem:[%s5066_s3 + $0xe] sm:$0x3] }
 0x113   : > { %3533 = vmatprep.mubr.msk.f32.mxu1 %vm723_vm2, %v4145_v34 }
 0x115   : > { %3612 = vmatmul.mubr.msk.f32.gmra.mxu0 %vm723_vm2, %v4201_v10 }
 0x116   : > { %3534 = vmatmul.mubr.msk.f32.gmra.mxu1 %vm723_vm2, %v4171_v47  ;;  %3614 = vmatprep.mubr.msk.f32.mxu0 %vm723_vm2, %v4217_v13 }
 0x117   : > { %3536 = vmatprep.mubr.msk.f32.mxu1 %vm723_vm2, %v4195_v61 }
 0x119   : > { %3615 = vmatmul.mubr.msk.f32.gmra.mxu0 %vm723_vm2, %v4228_v17 }
 0x11a   : > { %3537 = vmatmul.mubr.msk.f32.gmra.mxu1 %vm723_vm2, %v4201_v10  ;;  %3617 = vmatprep.mubr.msk.f32.mxu0 %vm723_vm2, %v4267_v41 }
 0x11b   : > { %3539 = vmatprep.mubr.msk.f32.mxu1 %vm723_vm2, %v4217_v13 }
 0x11d   : > { %3618 = vmatmul.mubr.msk.f32.gmra.mxu0 %vm723_vm2, %v4245_v20 }
 0x11e   : > { %3540 = vmatmul.mubr.msk.f32.gmra.mxu1 %vm723_vm2, %v4228_v17  ;;  %3620 = vmatprep.mubr.msk.f32.mxu0 %vm723_vm2, %v4298_v4 }
 0x11f   : > { %3542 = vmatprep.mubr.msk.f32.mxu1 %vm723_vm2, %v4267_v41 }
 0x121   : > { %3621 = vmatmul.mubr.msk.f32.gmra.mxu0 %vm723_vm2, %v4278_v56 }
 0x122   : > { %3543 = vmatmul.mubr.msk.f32.gmra.mxu1 %vm723_vm2, %v4245_v20  ;;  %3623 = vmatprep.mubr.msk.f32.mxu0 %vm723_vm2, %v4332_v46 }
 0x123   : > { %3545 = vmatprep.mubr.msk.f32.mxu1 %vm723_vm2, %v4298_v4 }
 0x125   : > { %3624 = vmatmul.mubr.msk.f32.gmra.mxu0 %vm723_vm2, %v4311_v29 }
 0x126   : > { %3546 = vmatmul.mubr.msk.f32.gmra.mxu1 %vm723_vm2, %v4278_v56  ;;  %3626 = vmatprep.mubr.msk.f32.mxu0 %vm723_vm2, %v4441_v39 }
 0x127   : > { %3548 = vmatprep.mubr.msk.f32.mxu1 %vm723_vm2, %v4332_v46 }
 0x129   : > { %3627 = vmatmul.mubr.msk.f32.gmra.mxu0 %vm723_vm2, %v4449_v50 }
 0x12a   : > { %3549 = vmatmul.mubr.msk.f32.gmra.mxu1 %vm723_vm2, %v4311_v29  ;;  %3657 = vmatprep.mubr.msk.f32.mxu0 %vm723_vm2, %v4191_v0 }
 0x12b   : > { %3579 = vmatprep.mubr.msk.f32.mxu1 %vm723_vm2, %v4154_v37  ;;  %v821_v37 = vld [vmem:[#allocation2 + $0x120] sm:$0xff] }
 0x12d   : > { %3658 = vmatmul.mubr.msk.f32.vlgmr.msra.gmra.mxu0 %vm723_vm2, %v4222_v11 }
 0x12e   : > { %3580 = vmatmul.mubr.msk.f32.vlgmr.msra.gmra.mxu1 %vm723_vm2, %v4175_v49  ;;  %3660 = vmatprep.mubr.msk.f32.mxu0 %vm723_vm2, %v4235_v19  ;;  %v4500_v49 = vld [vmem:[#allocation2 + $0x128] sm:$0xff] }
 0x12f   : > { %3630 = vmatpush3.msk.msra.mxu1 %vm923_vm4, %v3216_v33  ;;  %3582 = vmatprep.mubr.msk.f32.mxu1 %vm723_vm2, %v4191_v0  ;;  %v1603_v0 = vrot.slane %v4449_v50, 7 }
 0x130   : > { %3681 = vmatprep.subr.msk.mxu1 %vm923_vm4, %v3252_v3  ;;  %3708 = vmatpush3.msk.msra.mxu0 %vm923_vm4, %v3270_v12 }
 0x131   : > { %3661 = vmatmul.mubr.msk.f32.gmra.mxu0 %vm723_vm2, %v4262_v52 }
 0x132   : > { %3583 = vmatmul.mubr.msk.f32.gmra.mxu1 %vm723_vm2, %v4222_v11  ;;  %3663 = vmatprep.mubr.msk.f32.mxu0 %vm723_vm2, %v4257_v43  ;;  %v1602_v11 = vsel %vm849_vm13, %v1600_v44, %v1601_v45 }
 0x133   : > { %3585 = vmatprep.mubr.msk.f32.mxu1 %vm723_vm2, %v4235_v19  ;;  %v2220_v19 = vrot.slane %v821_v37, 7 }
 0x135   : > { %3664 = vmatmul.mubr.msk.f32.gmra.mxu0 %vm723_vm2, %v4290_v63 }
 0x136   : > { %3586 = vmatmul.mubr.msk.f32.gmra.mxu1 %vm723_vm2, %v4262_v52  ;;  %3666 = vmatprep.mubr.msk.f32.mxu0 %vm723_vm2, %v4293_v1  ;;  %v4513_v52 = vld [vmem:[#allocation2 + $0x130] sm:$0xff] }
 0x137   : > { %3588 = vmatprep.mubr.msk.f32.mxu1 %vm723_vm2, %v4257_v43  ;;  %v2221_v43 = vrot.slane %v4500_v49, 7 }
 0x139   : > { %3667 = vmatmul.mubr.msk.f32.gmra.mxu0 %vm723_vm2, %v4328_v25  ;;  %v2222_v32 = vsel %vm849_vm13, %v2220_v19, %v2221_v43 }
 0x13a   : > { %3589 = vmatmul.mubr.msk.f32.gmra.mxu1 %vm723_vm2, %v4290_v63  ;;  %3669 = vmatprep.mubr.msk.f32.mxu0 %vm723_vm2, %v4324_v30  ;;  %v1604_v63 = vsel %vm849_vm13, %v1601_v45, %v1603_v0 }
 0x13b   : > { %3591 = vmatprep.mubr.msk.f32.mxu1 %vm723_vm2, %v4293_v1  ;;  %v2223_v1 = vrot.slane %v4513_v52, 7 }
 0x13d   : > { %3670 = vmatmul.mubr.msk.f32.gmra.mxu0 %vm723_vm2, %v4355_v62  ;;  %v2224_v16 = vsel %vm849_vm13, %v2221_v43, %v2223_v1 }
 0x13e   : > { %3592 = vmatmul.mubr.msk.f32.gmra.mxu1 %vm723_vm2, %v4328_v25  ;;  %3672 = vmatprep.mubr.msk.f32.mxu0 %vm723_vm2, %v4349_v57 }
 0x13f   : > { %3594 = vmatprep.mubr.msk.f32.mxu1 %vm723_vm2, %v4324_v30 }
 0x141   : > { %3673 = vmatmul.mubr.msk.f32.gmra.mxu0 %vm723_vm2, %v4371_v7 }
 0x142   : > { %3595 = vmatmul.mubr.msk.f32.gmra.mxu1 %vm723_vm2, %v4355_v62  ;;  %3675 = vmatprep.mubr.msk.f32.mxu0 %vm723_vm2, %v1602_v11 }
 0x143   : > { %3597 = vmatprep.mubr.msk.f32.mxu1 %vm723_vm2, %v4349_v57 }
 0x145   : > { %3676 = vmatmul.mubr.msk.f32.gmra.mxu0 %vm723_vm2, %v1604_v63 }
 0x146   : > { %3598 = vmatmul.mubr.msk.f32.gmra.mxu1 %vm723_vm2, %v4371_v7  ;;  %3678 = vmatprep.mubr.msk.f32.mxu0 %vm723_vm2, %v2222_v32 }
 0x147   : > { %3600 = vmatprep.mubr.msk.f32.mxu1 %vm723_vm2, %v1602_v11 }
 0x149   : > { %3679 = vmatmul.mubr.msk.f32.gmra.mxu0 %vm723_vm2, %v2224_v16 }
 0x14a   : > { %3601 = vmatmul.mubr.msk.f32.gmra.mxu1 %vm723_vm2, %v1604_v63  ;;  %3709 = vmatprep.mubr.msk.f32.mxu0 %vm723_vm2, %v4205_v27 }
 0x14b   : > { %3631 = vmatprep.mubr.msk.f32.mxu1 %vm723_vm2, %v4157_v38  ;;  %v2010_v38 = vrot.slane %v4441_v39, 1 }
 0x14d   : > { %3710 = vmatmul.mubr.msk.f32.vlgmr.msra.gmra.mxu0 %vm723_vm2, %v4212_v5 }
 0x14e   : > { %3632 = vmatmul.mubr.msk.f32.vlgmr.msra.gmra.mxu1 %vm723_vm2, %v4180_v51  ;;  %3712 = vmatprep.mubr.msk.f32.mxu0 %vm723_vm2, %v4242_v35  ;;  %v2011_v51 = vrot.slane %v4449_v50, 1 }
 0x14f   : > { %3682 = vmatpush3.msk.msra.mxu1 %vm923_vm4, %v3252_v3  ;;  %3634 = vmatprep.mubr.msk.f32.mxu1 %vm723_vm2, %v4205_v27  ;;  %v820_v27 = vld [vmem:[#allocation2 + $0x118] sm:$0x1] }
 0x151   : > { %3713 = vmatmul.mubr.msk.f32.gmra.mxu0 %vm723_vm2, %v4252_v40 }
 0x152   : > { %3635 = vmatmul.mubr.msk.f32.gmra.mxu1 %vm723_vm2, %v4212_v5  ;;  %3715 = vmatprep.mubr.msk.f32.mxu0 %vm723_vm2, %v4273_v21  ;;  %v2630_v5 = vrot.slane %v4500_v49, 1 }
 0x153   : > { %3637 = vmatprep.mubr.msk.f32.mxu1 %vm723_vm2, %v4242_v35  ;;  %v2631_v35 = vrot.slane %v4513_v52, 1 }
 0x155   : > { %3716 = vmatmul.mubr.msk.f32.gmra.mxu0 %vm723_vm2, %v4287_v14  ;;  %v2632_v18 = vsel %vm1326_vm12, %v2630_v5, %v2631_v35 }
 0x156   : > { %3638 = vmatmul.mubr.msk.f32.gmra.mxu1 %vm723_vm2, %v4252_v40  ;;  %3718 = vmatprep.mubr.msk.f32.mxu0 %vm723_vm2, %v4296_v2  ;;  %v824_v40 = vld [vmem:[#allocation2 + $0x138] sm:$0x1] }
 0x157   : > { %3640 = vmatprep.mubr.msk.f32.mxu1 %vm723_vm2, %v4273_v21  ;;  %v2013_v21 = vrot.slane %v820_v27, 1 }
 0x159   : > { %3719 = vmatmul.mubr.msk.f32.gmra.mxu0 %vm723_vm2, %v4318_v22 }
 0x15a   : > { %3641 = vmatmul.mubr.msk.f32.gmra.mxu1 %vm723_vm2, %v4287_v14  ;;  %3721 = vmatprep.mubr.msk.f32.mxu0 %vm723_vm2, %v4321_v26  ;;  %v2012_v14 = vsel %vm1326_vm12, %v2010_v38, %v2011_v51 }
 0x15b   : > { %3643 = vmatprep.mubr.msk.f32.mxu1 %vm723_vm2, %v4296_v2  ;;  %v2633_v2 = vrot.slane %v824_v40, 1 }
 0x15d   : > { %3722 = vmatmul.mubr.msk.f32.gmra.mxu0 %vm723_vm2, %v4346_v55 }
 0x15e   : > { %3644 = vmatmul.mubr.msk.f32.gmra.mxu1 %vm723_vm2, %v4318_v22  ;;  %3724 = vmatprep.mubr.msk.f32.mxu0 %vm723_vm2, %v4352_v58  ;;  %v2014_v22 = vsel %vm1326_vm12, %v2011_v51, %v2013_v21 }
 0x15f   : > { %3646 = vmatprep.mubr.msk.f32.mxu1 %vm723_vm2, %v4321_v26  ;;  %v2634_v26 = vsel %vm1326_vm12, %v2631_v35, %v2633_v2 }
 0x161   : > { %3725 = vmatmul.mubr.msk.f32.gmra.mxu0 %vm723_vm2, %v4368_v53 }
 0x162   : > { %3647 = vmatmul.mubr.msk.f32.gmra.mxu1 %vm723_vm2, %v4346_v55  ;;  %3727 = vmatprep.mubr.msk.f32.mxu0 %vm723_vm2, %v2012_v14 }
 0x163   : > { %3649 = vmatprep.mubr.msk.f32.mxu1 %vm723_vm2, %v4352_v58 }
 0x165   : > { %3728 = vmatmul.mubr.msk.f32.gmra.mxu0 %vm723_vm2, %v2014_v22 }
 0x166   : > { %3650 = vmatmul.mubr.msk.f32.gmra.mxu1 %vm723_vm2, %v4368_v53  ;;  %3730 = vmatprep.mubr.msk.f32.mxu0 %vm723_vm2, %v2632_v18 }
 0x167   : > { %3652 = vmatprep.mubr.msk.f32.mxu1 %vm723_vm2, %v2012_v14 }
 0x169   : > { %3731 = vmatmul.mubr.msk.f32.gmra.mxu0 %vm723_vm2, %v2634_v26 }
 0x16a   : > { %3653 = vmatmul.mubr.msk.f32.gmra.mxu1 %vm723_vm2, %v2014_v22 }
 0x16b   : > { %3683 = vmatprep.mubr.msk.f32.mxu1 %vm723_vm2, %v4145_v34 }
 0x16e   : > { %3684 = vmatmul.mubr.msk.f32.vlgmr.msra.gmra.mxu1 %vm723_vm2, %v4171_v47 }
 0x16f   : > { %3686 = vmatprep.mubr.msk.f32.mxu1 %vm723_vm2, %v4195_v61 }
 0x172   : > { %3687 = vmatmul.mubr.msk.f32.gmra.mxu1 %vm723_vm2, %v4201_v10 }
 0x173   : > { %3689 = vmatprep.mubr.msk.f32.mxu1 %vm723_vm2, %v4217_v13 }
 0x176   : > { %3690 = vmatmul.mubr.msk.f32.gmra.mxu1 %vm723_vm2, %v4228_v17 }
 0x177   : > { %3692 = vmatprep.mubr.msk.f32.mxu1 %vm723_vm2, %v4267_v41 }
 0x17a   : > { %3693 = vmatmul.mubr.msk.f32.gmra.mxu1 %vm723_vm2, %v4245_v20 }
 0x17b   : > { %3695 = vmatprep.mubr.msk.f32.mxu1 %vm723_vm2, %v4298_v4 }
 0x17e   : > { %3696 = vmatmul.mubr.msk.f32.gmra.mxu1 %vm723_vm2, %v4278_v56 }
 0x17f   : > { %3698 = vmatprep.mubr.msk.f32.mxu1 %vm723_vm2, %v4332_v46 }
 0x182   : > { %3699 = vmatmul.mubr.msk.f32.gmra.mxu1 %vm723_vm2, %v4311_v29 }
 0x183   : > { %3701 = vmatprep.mubr.msk.f32.mxu1 %vm723_vm2, %v4441_v39 }
 0x186   : > { %3702 = vmatmul.mubr.msk.f32.gmra.mxu1 %vm723_vm2, %v4449_v50 }
 0x187   : > { %3704 = vmatprep.mubr.msk.f32.mxu1 %vm723_vm2, %v4500_v49 }
 0x18a   : > { %3705 = vmatmul.mubr.msk.f32.gmra.mxu1 %vm723_vm2, %v4513_v52 }
 0x1ab   : > { %v3503_v34 = vpop.f32.mrf.mxu1  ;;  %v4632_v47 = vpop.f32.mrf.mxu0 }
 0x1ac   : > { %1073 = vst.msk [vmem:[#allocation3 + $0x8] sm:$0xff] %vm351_vm1, %v3503_v34 }
 0x1ad   : > { %v993_v61 = vpop.f32.mrf.mxu1  ;;  %v4635_v10 = vpop.f32.mrf.mxu0 }
 0x1ae   : > { %1072 = vst.msk [vmem:[#allocation3] sm:$0xff] %vm351_vm1, %v993_v61 }
 0x1b0   : > { %v3506_v13 = vpop.f32.mrf.mxu1  ;;  %v4638_v17 = vpop.f32.mrf.mxu0 }
 0x1b1   : > { %1075 = vst.msk [vmem:[#allocation3 + $0x18] sm:$0xff] %vm351_vm1, %v3506_v13 }
 0x1b2   : > { %v1003_v20 = vpop.f32.mrf.mxu1  ;;  %v4641_v41 = vpop.f32.mrf.mxu0 }
 0x1b3   : > { %1074 = vst.msk [vmem:[#allocation3 + $0x10] sm:$0xff] %vm351_vm1, %v1003_v20  ;;  %v1271_v12 = vld [vmem:[#allocation3 + $0x8] sm:$0xff] }
 0x1b5   : > { %v4644_v56 = vpop.f32.mrf.mxu0  ;;  %v1270_v8 = vld [vmem:[#allocation3] sm:$0xff] }
 0x1b6   : > { %v3509_v4 = vpop.f32.mrf.mxu1 }
 0x1b7   : > { %1077 = vst.msk [vmem:[#allocation3 + $0x28] sm:$0xff] %vm351_vm1, %v3509_v4  ;;  %v4647_v29 = vpop.f32.mrf.mxu0 }
 0x1b8   : > { %v1013_v23 = vpop.f32.mrf.mxu1  ;;  %v1273_v49 = vld [vmem:[#allocation3 + $0x18] sm:$0xff] }
 0x1b9   : > { %1076 = vst.msk [vmem:[#allocation3 + $0x20] sm:$0xff] %vm351_vm1, %v1013_v23  ;;  %v4650_v30 = vpop.f32.mrf.mxu0 }
 0x1ba   : > { %v3512_v31 = vpop.f32.mrf.mxu1  ;;  %v1272_v43 = vld [vmem:[#allocation3 + $0x10] sm:$0xff] }
 0x1bb   : > { %1079 = vst.msk [vmem:[#allocation3 + $0x38] sm:$0xff] %vm351_vm1, %v3512_v31  ;;  %v4653_v24 = vpop.f32.mrf.mxu0 }
 0x1bc   : > { %v1023_v25 = vpop.f32.mrf.mxu1 }
 0x1bd   : > { %1078 = vst.msk [vmem:[#allocation3 + $0x30] sm:$0xff] %vm351_vm1, %v1023_v25  ;;  %v4656_v46 = vpop.f32.mrf.mxu0 }
 0x1be   : > { %v3515_v59 = vpop.f32.mrf.mxu1  ;;  %v1275_v32 = vld [vmem:[#allocation3 + $0x28] sm:$0xff] }
 0x1bf   : > { %1081 = vst.msk [vmem:[#allocation3 + $0x48] sm:$0xff] %vm351_vm1, %v3515_v59  ;;  %v4659_v9 = vpop.f32.mrf.mxu0 }
 0x1c0   : > { %v1033_v48 = vpop.f32.mrf.mxu1  ;;  %v1274_v27 = vld [vmem:[#allocation3 + $0x20] sm:$0xff] }
 0x1c1   : > { %1080 = vst.msk [vmem:[#allocation3 + $0x40] sm:$0xff] %vm351_vm1, %v1033_v48  ;;  %v4662_v28 = vpop.f32.mrf.mxu0 }
 0x1c2   : > { %v3518_v15 = vpop.f32.mrf.mxu1  ;;  %v1277_v2 = vld [vmem:[#allocation3 + $0x38] sm:$0xff] }
 0x1c3   : > { %1083 = vst.msk [vmem:[#allocation3 + $0x58] sm:$0xff] %vm351_vm1, %v3518_v15  ;;  %v4665_v42 = vpop.f32.mrf.mxu0 }
 0x1c4   : > { %v1043_v54 = vpop.f32.mrf.mxu1  ;;  %v1276_v13 = vld [vmem:[#allocation3 + $0x30] sm:$0xff] }
 0x1c5   : > { %1082 = vst.msk [vmem:[#allocation3 + $0x50] sm:$0xff] %vm351_vm1, %v1043_v54  ;;  %v4668_v55 = vpop.f32.mrf.mxu0 }
 0x1c6   : > { %v3521_v57 = vpop.f32.mrf.mxu1  ;;  %v1279_v25 = vld [vmem:[#allocation3 + $0x48] sm:$0xff] }
 0x1c7   : > { %1085 = vst.msk [vmem:[#allocation3 + $0x68] sm:$0xff] %vm351_vm1, %v3521_v57  ;;  %v4671_v58 = vpop.f32.mrf.mxu0 }
 0x1c8   : > { %v1053_v60 = vpop.f32.mrf.mxu1  ;;  %v1278_v57 = vld [vmem:[#allocation3 + $0x40] sm:$0xff] }
 0x1c9   : > { %1084 = vst.msk [vmem:[#allocation3 + $0x60] sm:$0xff] %vm351_vm1, %v1053_v60  ;;  %v4674_v62 = vpop.f32.mrf.mxu0 }
 0x1ca   : > { %v3524_v6 = vpop.f32.mrf.mxu1 }
 0x1cb   : > { %1087 = vst.msk [vmem:[#allocation3 + $0x78] sm:$0xff] %vm351_vm1, %v3524_v6  ;;  %v4677_v36 = vpop.f32.mrf.mxu0 }
 0x1cc   : > { %v1063_v53 = vpop.f32.mrf.mxu1 }
 0x1cd   : > { %1086 = vst.msk [vmem:[#allocation3 + $0x70] sm:$0xff] %vm351_vm1, %v1063_v53  ;;  %v4680_v7 = vpop.f32.mrf.mxu0 }
 0x1ce   : > { %v3529_v33 = vpop.f32.mrf.mxu1 }
 0x1cf   : > { %v1287_v39 = vadd.f32 %v3529_v33, %v1271_v12  ;;  %v4682_v50 = vpop.f32.mrf.mxu0  ;;  %v1281_v12 = vld [vmem:[#allocation3 + $0x58] sm:$0xff] }
 0x1d0   : > { %v1191_v3 = vpop.f32.mrf.mxu1 }
 0x1d1   : > { %1303 = vst.msk [vmem:[#allocation3 + $0x8] sm:$0xff] %vm351_vm1, %v1287_v39  ;;  %v1286_v45 = vadd.f32 %v1270_v8, %v1191_v3  ;;  %v4685_v44 = vpop.f32.mrf.mxu0 }
 0x1d2   : > { %v3532_v37 = vpop.f32.mrf.mxu1 }
 0x1d3   : > { %1302 = vst.msk [vmem:[#allocation3] sm:$0xff] %vm351_vm1, %v1286_v45  ;;  %v1289_v0 = vadd.f32 %v3532_v37, %v1273_v49  ;;  %v4688_v11 = vpop.f32.mrf.mxu0  ;;  %v1280_v37 = vld [vmem:[#allocation3 + $0x50] sm:$0xff] }
 0x1d4   : > { %v1201_v19 = vpop.f32.mrf.mxu1 }
 0x1d5   : > { %1305 = vst.msk [vmem:[#allocation3 + $0x18] sm:$0xff] %vm351_vm1, %v1289_v0  ;;  %v1288_v52 = vadd.f32 %v1272_v43, %v1201_v19  ;;  %v4691_v63 = vpop.f32.mrf.mxu0 }
 0x1d6   : > { %v3535_v1 = vpop.f32.mrf.mxu1 }
 0x1d7   : > { %1304 = vst.msk [vmem:[#allocation3 + $0x10] sm:$0xff] %vm351_vm1, %v1288_v52  ;;  %v1291_v16 = vadd.f32 %v3535_v1, %v1275_v32  ;;  %v4694_v38 = vpop.f32.mrf.mxu0  ;;  %v1283_v52 = vld [vmem:[#allocation3 + $0x68] sm:$0xff] }
 0x1d8   : > { %v1211_v51 = vpop.f32.mrf.mxu1  ;;  %v1550_v5 = vld [vmem:[#allocation3 + $0x8] sm:$0xff] }
 0x1d9   : > { %1307 = vst.msk [vmem:[#allocation3 + $0x28] sm:$0xff] %vm351_vm1, %v1291_v16  ;;  %v1290_v35 = vadd.f32 %v1274_v27, %v1211_v51  ;;  %v4697_v40 = vpop.f32.mrf.mxu0  ;;  %v1566_v21 = vadd.f32 %v4632_v47, %v1550_v5  ;;  %v1282_v27 = vld [vmem:[#allocation3 + $0x60] sm:$0xff] }
 0x1da   : > { %v3538_v14 = vpop.f32.mrf.mxu1  ;;  %v1549_v18 = vld [vmem:[#allocation3] sm:$0xff] }
 0x1db   : > { %1306 = vst.msk [vmem:[#allocation3 + $0x20] sm:$0xff] %vm351_vm1, %v1290_v35  ;;  %v1293_v22 = vadd.f32 %v3538_v14, %v1277_v2  ;;  %v4701_v26 = vpop.f32.mrf.mxu0  ;;  %1582 = vst.msk [vmem:[#allocation3 + $0x8] sm:$0xff] %vm351_vm1, %v1566_v21  ;;  %v1565_v34 = vadd.f32 %v1549_v18, %v4635_v10  ;;  %v1285_v2 = vld [vmem:[#allocation3 + $0x78] sm:$0xff] }
 0x1dc   : > { %v1221_v61 = vpop.f32.mrf.mxu1  ;;  %v1552_v20 = vld [vmem:[#allocation3 + $0x18] sm:$0xff] }
 0x1dd   : > { %1309 = vst.msk [vmem:[#allocation3 + $0x38] sm:$0xff] %vm351_vm1, %v1293_v22  ;;  %v1292_v4 = vadd.f32 %v1276_v13, %v1221_v61  ;;  %v4706_v23 = vpop.f32.mrf.mxu0  ;;  %1581 = vst.msk [vmem:[#allocation3] sm:$0xff] %vm351_vm1, %v1565_v34  ;;  %v1568_v47 = vadd.f32 %v4638_v17, %v1552_v20  ;;  %v1284_v13 = vld [vmem:[#allocation3 + $0x70] sm:$0xff] }
 0x1de   : > { %v3541_v31 = vpop.f32.mrf.mxu1  ;;  %v1551_v59 = vld [vmem:[#allocation3 + $0x10] sm:$0xff] }
 0x1df   : > { %1308 = vst.msk [vmem:[#allocation3 + $0x30] sm:$0xff] %vm351_vm1, %v1292_v4  ;;  %v1295_v48 = vadd.f32 %v3541_v31, %v1279_v25  ;;  %v4711_v15 = vpop.f32.mrf.mxu0  ;;  %1584 = vst.msk [vmem:[#allocation3 + $0x18] sm:$0xff] %vm351_vm1, %v1568_v47  ;;  %v1567_v10 = vadd.f32 %v1551_v59, %v4641_v41 }
 0x1e0   : > { %v1231_v54 = vpop.f32.mrf.mxu1  ;;  %v1554_v60 = vld [vmem:[#allocation3 + $0x28] sm:$0xff] }
 0x1e1   : > { %1311 = vst.msk [vmem:[#allocation3 + $0x48] sm:$0xff] %vm351_vm1, %v1295_v48  ;;  %v1294_v6 = vadd.f32 %v1278_v57, %v1231_v54  ;;  %v4716_v53 = vpop.f32.mrf.mxu0  ;;  %1583 = vst.msk [vmem:[#allocation3 + $0x10] sm:$0xff] %vm351_vm1, %v1567_v10  ;;  %v1570_v17 = vadd.f32 %v4644_v56, %v1554_v60 }
 0x1e2   : > { %v3544_v33 = vpop.f32.mrf.mxu1  ;;  %v1553_v39 = vld [vmem:[#allocation3 + $0x20] sm:$0xff]  ;;  %v1760_v25 = vld [vmem:[#allocation3 + $0x8] sm:$0xff] }
 0x1e3   : > { %1310 = vst.msk [vmem:[#allocation3 + $0x40] sm:$0xff] %vm351_vm1, %v1294_v6  ;;  %v1297_v3 = vadd.f32 %v3544_v33, %v1281_v12  ;;  %v4721_v8 = vpop.f32.mrf.mxu0  ;;  %1586 = vst.msk [vmem:[#allocation3 + $0x28] sm:$0xff] %vm351_vm1, %v1570_v17  ;;  %v1569_v41 = vadd.f32 %v1553_v39, %v4647_v29 }
 0x1e4   : > { %v1241_v45 = vpop.f32.mrf.mxu1  ;;  %v1556_v49 = vld [vmem:[#allocation3 + $0x38] sm:$0xff]  ;;  %v1759_v57 = vld [vmem:[#allocation3] sm:$0xff] }
 0x1e5   : > { %1313 = vst.msk [vmem:[#allocation3 + $0x58] sm:$0xff] %vm351_vm1, %v1297_v3  ;;  %v1296_v0 = vadd.f32 %v1280_v37, %v1241_v45  ;;  %v4726_v19 = vpop.f32.mrf.mxu0  ;;  %1585 = vst.msk [vmem:[#allocation3 + $0x20] sm:$0xff] %vm351_vm1, %v1569_v41  ;;  %v1572_v56 = vadd.f32 %v4650_v30, %v1556_v49 }
 0x1e6   : > { %v3547_v43 = vpop.f32.mrf.mxu1  ;;  %v1555_v1 = vld [vmem:[#allocation3 + $0x30] sm:$0xff]  ;;  %v1762_v12 = vld [vmem:[#allocation3 + $0x18] sm:$0xff] }
 0x1e7   : > { %1312 = vst.msk [vmem:[#allocation3 + $0x50] sm:$0xff] %vm351_vm1, %v1296_v0  ;;  %v1299_v32 = vadd.f32 %v3547_v43, %v1283_v52  ;;  %v4731_v16 = vpop.f32.mrf.mxu0  ;;  %1588 = vst.msk [vmem:[#allocation3 + $0x38] sm:$0xff] %vm351_vm1, %v1572_v56  ;;  %v1571_v29 = vadd.f32 %v1555_v1, %v4653_v24 }
 0x1e8   : > { %v1251_v51 = vpop.f32.mrf.mxu1  ;;  %v1558_v5 = vld [vmem:[#allocation3 + $0x48] sm:$0xff]  ;;  %v1761_v37 = vld [vmem:[#allocation3 + $0x10] sm:$0xff] }
 0x1e9   : > { %1315 = vst.msk [vmem:[#allocation3 + $0x68] sm:$0xff] %vm351_vm1, %v1299_v32  ;;  %v1298_v35 = vadd.f32 %v1282_v27, %v1251_v51  ;;  %v4736_v21 = vpop.f32.mrf.mxu0  ;;  %1587 = vst.msk [vmem:[#allocation3 + $0x30] sm:$0xff] %vm351_vm1, %v1571_v29  ;;  %v1574_v30 = vadd.f32 %v4656_v46, %v1558_v5 }
 0x1ea   : > { %v3550_v14 = vpop.f32.mrf.mxu1  ;;  %v1557_v18 = vld [vmem:[#allocation3 + $0x40] sm:$0xff]  ;;  %v1764_v52 = vld [vmem:[#allocation3 + $0x28] sm:$0xff] }
 0x1eb   : > { %1314 = vst.msk [vmem:[#allocation3 + $0x60] sm:$0xff] %vm351_vm1, %v1298_v35  ;;  %v1301_v22 = vadd.f32 %v3550_v14, %v1285_v2  ;;  %v4741_v34 = vpop.f32.mrf.mxu0  ;;  %1590 = vst.msk [vmem:[#allocation3 + $0x48] sm:$0xff] %vm351_vm1, %v1574_v30  ;;  %v1573_v24 = vadd.f32 %v1557_v18, %v4659_v9 }
 0x1ec   : > { %v1261_v61 = vpop.f32.mrf.mxu1  ;;  %v1560_v20 = vld [vmem:[#allocation3 + $0x58] sm:$0xff]  ;;  %v1763_v27 = vld [vmem:[#allocation3 + $0x20] sm:$0xff] }
 0x1ed   : > { %1317 = vst.msk [vmem:[#allocation3 + $0x78] sm:$0xff] %vm351_vm1, %v1301_v22  ;;  %v1300_v4 = vadd.f32 %v1284_v13, %v1261_v61  ;;  %v4746_v47 = vpop.f32.mrf.mxu0  ;;  %1589 = vst.msk [vmem:[#allocation3 + $0x40] sm:$0xff] %vm351_vm1, %v1573_v24  ;;  %v1576_v46 = vadd.f32 %v4662_v28, %v1560_v20 }
 0x1ee   : > { %v3581_v31 = vpop.f32.mrf.mxu1  ;;  %v1559_v59 = vld [vmem:[#allocation3 + $0x50] sm:$0xff]  ;;  %v1766_v2 = vld [vmem:[#allocation3 + $0x38] sm:$0xff] }
 0x1ef   : > { %1316 = vst.msk [vmem:[#allocation3 + $0x70] sm:$0xff] %vm351_vm1, %v1300_v4  ;;  %v1776_v48 = vadd.f32 %v3581_v31, %v1760_v25  ;;  %v4751_v10 = vpop.f32.mrf.mxu0  ;;  %1592 = vst.msk [vmem:[#allocation3 + $0x58] sm:$0xff] %vm351_vm1, %v1576_v46  ;;  %v1575_v9 = vadd.f32 %v1559_v59, %v4665_v42 }
 0x1f0   : > { %v1680_v54 = vpop.f32.mrf.mxu1  ;;  %v1562_v60 = vld [vmem:[#allocation3 + $0x68] sm:$0xff]  ;;  %v1765_v13 = vld [vmem:[#allocation3 + $0x30] sm:$0xff] }
 0x1f1   : > { %1792 = vst.msk [vmem:[#allocation3 + $0x8] sm:$0xff] %vm351_vm1, %v1776_v48  ;;  %v1775_v6 = vadd.f32 %v1759_v57, %v1680_v54  ;;  %v4756_v17 = vpop.f32.mrf.mxu0  ;;  %1591 = vst.msk [vmem:[#allocation3 + $0x50] sm:$0xff] %vm351_vm1, %v1575_v9  ;;  %v1578_v28 = vadd.f32 %v4668_v55, %v1562_v60 }
 0x1f2   : > { %v3584_v33 = vpop.f32.mrf.mxu1  ;;  %v1561_v39 = vld [vmem:[#allocation3 + $0x60] sm:$0xff]  ;;  %v1768_v25 = vld [vmem:[#allocation3 + $0x48] sm:$0xff] }
 0x1f3   : > { %1791 = vst.msk [vmem:[#allocation3] sm:$0xff] %vm351_vm1, %v1775_v6  ;;  %v1778_v3 = vadd.f32 %v3584_v33, %v1762_v12  ;;  %v4761_v41 = vpop.f32.mrf.mxu0  ;;  %1594 = vst.msk [vmem:[#allocation3 + $0x68] sm:$0xff] %vm351_vm1, %v1578_v28  ;;  %v1577_v42 = vadd.f32 %v1561_v39, %v4671_v58 }
 0x1f4   : > { %v1690_v45 = vpop.f32.mrf.mxu1  ;;  %v1564_v49 = vld [vmem:[#allocation3 + $0x78] sm:$0xff]  ;;  %v1767_v54 = vld [vmem:[#allocation3 + $0x40] sm:$0xff] }
 0x1f5   : > { %1794 = vst.msk [vmem:[#allocation3 + $0x18] sm:$0xff] %vm351_vm1, %v1778_v3  ;;  %v1777_v0 = vadd.f32 %v1761_v37, %v1690_v45  ;;  %v4766_v56 = vpop.f32.mrf.mxu0  ;;  %1593 = vst.msk [vmem:[#allocation3 + $0x60] sm:$0xff] %vm351_vm1, %v1577_v42  ;;  %v1580_v55 = vadd.f32 %v4674_v62, %v1564_v49 }
 0x1f6   : > { %v3587_v43 = vpop.f32.mrf.mxu1  ;;  %v1563_v1 = vld [vmem:[#allocation3 + $0x70] sm:$0xff]  ;;  %v1770_v33 = vld [vmem:[#allocation3 + $0x58] sm:$0xff] }
 0x1f7   : > { %1793 = vst.msk [vmem:[#allocation3 + $0x10] sm:$0xff] %vm351_vm1, %v1777_v0  ;;  %v1780_v32 = vadd.f32 %v3587_v43, %v1764_v52  ;;  %v4771_v29 = vpop.f32.mrf.mxu0  ;;  %1596 = vst.msk [vmem:[#allocation3 + $0x78] sm:$0xff] %vm351_vm1, %v1580_v55  ;;  %v1579_v58 = vadd.f32 %v1563_v1, %v4677_v36 }
 0x1f8   : > { %v1700_v51 = vpop.f32.mrf.mxu1  ;;  %v1962_v5 = vld [vmem:[#allocation3 + $0x8] sm:$0xff]  ;;  %v1769_v42 = vld [vmem:[#allocation3 + $0x50] sm:$0xff] }
 0x1f9   : > { %1796 = vst.msk [vmem:[#allocation3 + $0x28] sm:$0xff] %vm351_vm1, %v1780_v32  ;;  %v1779_v35 = vadd.f32 %v1763_v27, %v1700_v51  ;;  %v4776_v30 = vpop.f32.mrf.mxu0  ;;  %1595 = vst.msk [vmem:[#allocation3 + $0x70] sm:$0xff] %vm351_vm1, %v1579_v58  ;;  %v1978_v62 = vadd.f32 %v4680_v7, %v1962_v5 }
 0x1fa   : > { %v3590_v14 = vpop.f32.mrf.mxu1  ;;  %v1961_v18 = vld [vmem:[#allocation3] sm:$0xff]  ;;  %v1772_v55 = vld [vmem:[#allocation3 + $0x68] sm:$0xff] }
 0x1fb   : > { %1795 = vst.msk [vmem:[#allocation3 + $0x20] sm:$0xff] %vm351_vm1, %v1779_v35  ;;  %v1782_v22 = vadd.f32 %v3590_v14, %v1766_v2  ;;  %v4781_v24 = vpop.f32.mrf.mxu0  ;;  %1994 = vst.msk [vmem:[#allocation3 + $0x8] sm:$0xff] %vm351_vm1, %v1978_v62  ;;  %v1977_v36 = vadd.f32 %v1961_v18, %v4682_v50 }
 0x1fc   : > { %v1710_v61 = vpop.f32.mrf.mxu1  ;;  %v1964_v20 = vld [vmem:[#allocation3 + $0x18] sm:$0xff]  ;;  %v1771_v32 = vld [vmem:[#allocation3 + $0x60] sm:$0xff] }
 0x1fd   : > { %1798 = vst.msk [vmem:[#allocation3 + $0x38] sm:$0xff] %vm351_vm1, %v1782_v22  ;;  %v1781_v4 = vadd.f32 %v1765_v13, %v1710_v61  ;;  %v4786_v46 = vpop.f32.mrf.mxu0  ;;  %1993 = vst.msk [vmem:[#allocation3] sm:$0xff] %vm351_vm1, %v1977_v36  ;;  %v1980_v7 = vadd.f32 %v4685_v44, %v1964_v20 }
 0x1fe   : > { %v3593_v31 = vpop.f32.mrf.mxu1  ;;  %v1963_v59 = vld [vmem:[#allocation3 + $0x10] sm:$0xff]  ;;  %v1774_v35 = vld [vmem:[#allocation3 + $0x78] sm:$0xff] }
 0x1ff   : > { %1797 = vst.msk [vmem:[#allocation3 + $0x30] sm:$0xff] %vm351_vm1, %v1781_v4  ;;  %v1784_v48 = vadd.f32 %v3593_v31, %v1768_v25  ;;  %1996 = vst.msk [vmem:[#allocation3 + $0x18] sm:$0xff] %vm351_vm1, %v1980_v7  ;;  %v1979_v50 = vadd.f32 %v1963_v59, %v4688_v11  ;;  %v4794_v6 = vpop.f32.mrf.mxu0 }
 0x200   : > { %v1720_v9 = vpop.f32.mrf.mxu1  ;;  %v1966_v57 = vld [vmem:[#allocation3 + $0x28] sm:$0xff]  ;;  %v1773_v18 = vld [vmem:[#allocation3 + $0x70] sm:$0xff] }
 0x201   : > { %1800 = vst.msk [vmem:[#allocation3 + $0x48] sm:$0xff] %vm351_vm1, %v1784_v48  ;;  %v1783_v60 = vadd.f32 %v1767_v54, %v1720_v9  ;;  %1995 = vst.msk [vmem:[#allocation3 + $0x10] sm:$0xff] %vm351_vm1, %v1979_v50  ;;  %v1982_v44 = vadd.f32 %v4691_v63, %v1966_v57  ;;  %v4802_v37 = vpop.f32.mrf.mxu0 }
 0x202   : > { %v3596_v28 = vpop.f32.mrf.mxu1  ;;  %v1965_v12 = vld [vmem:[#allocation3 + $0x20] sm:$0xff]  ;;  %v2170_v20 = vld [vmem:[#allocation3 + $0x8] sm:$0xff] }
 0x203   : > { %1799 = vst.msk [vmem:[#allocation3 + $0x40] sm:$0xff] %vm351_vm1, %v1783_v60  ;;  %v1786_v39 = vadd.f32 %v3596_v28, %v1770_v33  ;;  %1998 = vst.msk [vmem:[#allocation3 + $0x28] sm:$0xff] %vm351_vm1, %v1982_v44  ;;  %v1981_v11 = vadd.f32 %v1965_v12, %v4694_v38  ;;  %v4809_v51 = vpop.f32.mrf.mxu0 }
 0x204   : > { %v1730_v3 = vpop.f32.mrf.mxu1  ;;  %v1968_v45 = vld [vmem:[#allocation3 + $0x38] sm:$0xff]  ;;  %v2169_v25 = vld [vmem:[#allocation3] sm:$0xff] }
 0x205   : > { %1802 = vst.msk [vmem:[#allocation3 + $0x58] sm:$0xff] %vm351_vm1, %v1786_v39  ;;  %v1785_v49 = vadd.f32 %v1769_v42, %v1730_v3  ;;  %1997 = vst.msk [vmem:[#allocation3 + $0x20] sm:$0xff] %vm351_vm1, %v1981_v11  ;;  %v1984_v63 = vadd.f32 %v4697_v40, %v1968_v45  ;;  %v4817_v36 = vpop.f32.mrf.mxu0 }
 0x206   : > { %v3599_v0 = vpop.f32.mrf.mxu1  ;;  %v1967_v43 = vld [vmem:[#allocation3 + $0x30] sm:$0xff]  ;;  %v2172_v54 = vld [vmem:[#allocation3 + $0x18] sm:$0xff] }
 0x207   : > { %1801 = vst.msk [vmem:[#allocation3 + $0x50] sm:$0xff] %vm351_vm1, %v1785_v49  ;;  %v1788_v52 = vadd.f32 %v3599_v0, %v1772_v55  ;;  %2000 = vst.msk [vmem:[#allocation3 + $0x38] sm:$0xff] %vm351_vm1, %v1984_v63  ;;  %v1983_v38 = vadd.f32 %v1967_v43, %v4701_v26  ;;  %v4825_v48 = vpop.f32.mrf.mxu0 }
 0x208   : > { %v1740_v1 = vpop.f32.mrf.mxu1  ;;  %v1970_v58 = vld [vmem:[#allocation3 + $0x48] sm:$0xff]  ;;  %v2171_v28 = vld [vmem:[#allocation3 + $0x10] sm:$0xff] }
 0x209   : > { %1804 = vst.msk [vmem:[#allocation3 + $0x68] sm:$0xff] %vm351_vm1, %v1788_v52  ;;  %v1787_v27 = vadd.f32 %v1771_v32, %v1740_v1  ;;  %1999 = vst.msk [vmem:[#allocation3 + $0x30] sm:$0xff] %vm351_vm1, %v1983_v38  ;;  %v1986_v40 = vadd.f32 %v4706_v23, %v1970_v58  ;;  %v4833_v12 = vpop.f32.mrf.mxu0 }
 0x20a   : > { %v3602_v5 = vpop.f32.mrf.mxu1  ;;  %v1969_v62 = vld [vmem:[#allocation3 + $0x40] sm:$0xff]  ;;  %v2174_v3 = vld [vmem:[#allocation3 + $0x28] sm:$0xff] }
 0x20b   : > { %1803 = vst.msk [vmem:[#allocation3 + $0x60] sm:$0xff] %vm351_vm1, %v1787_v27  ;;  %v1790_v14 = vadd.f32 %v3602_v5, %v1774_v35  ;;  %2002 = vst.msk [vmem:[#allocation3 + $0x48] sm:$0xff] %vm351_vm1, %v1986_v40  ;;  %v1985_v26 = vadd.f32 %v1969_v62, %v4711_v15  ;;  %v4841_v55 = vpop.f32.mrf.mxu0 }
 0x20c   : > { %v1750_v2 = vpop.f32.mrf.mxu1  ;;  %v1972_v22 = vld [vmem:[#allocation3 + $0x58] sm:$0xff]  ;;  %v2173_v63 = vld [vmem:[#allocation3 + $0x20] sm:$0xff] }
 0x20d   : > { %1806 = vst.msk [vmem:[#allocation3 + $0x78] sm:$0xff] %vm351_vm1, %v1790_v14  ;;  %v1789_v61 = vadd.f32 %v1773_v18, %v1750_v2  ;;  %2001 = vst.msk [vmem:[#allocation3 + $0x40] sm:$0xff] %vm351_vm1, %v1985_v26  ;;  %v1988_v23 = vadd.f32 %v4716_v53, %v1972_v22  ;;  %v4849_v5 = vpop.f32.mrf.mxu0 }
 0x20e   : > { %v3633_v13 = vpop.f32.mrf.mxu1  ;;  %v1971_v4 = vld [vmem:[#allocation3 + $0x50] sm:$0xff]  ;;  %v2176_v38 = vld [vmem:[#allocation3 + $0x38] sm:$0xff] }
 0x20f   : > { %1805 = vst.msk [vmem:[#allocation3 + $0x70] sm:$0xff] %vm351_vm1, %v1789_v61  ;;  %v2186_v7 = vadd.f32 %v3633_v13, %v2170_v20  ;;  %2004 = vst.msk [vmem:[#allocation3 + $0x58] sm:$0xff] %vm351_vm1, %v1988_v23  ;;  %v1987_v15 = vadd.f32 %v1971_v4, %v4721_v8  ;;  %v4857_v23 = vpop.f32.mrf.mxu0 }
 0x210   : > { %v2090_v31 = vpop.f32.mrf.mxu1  ;;  %v1974_v59 = vld [vmem:[#allocation3 + $0x68] sm:$0xff]  ;;  %v2175_v27 = vld [vmem:[#allocation3 + $0x30] sm:$0xff] }
 0x211   : > { %2202 = vst.msk [vmem:[#allocation3 + $0x8] sm:$0xff] %vm351_vm1, %v2186_v7  ;;  %v2185_v50 = vadd.f32 %v2169_v25, %v2090_v31  ;;  %2003 = vst.msk [vmem:[#allocation3 + $0x50] sm:$0xff] %vm351_vm1, %v1987_v15  ;;  %v1990_v53 = vadd.f32 %v4726_v19, %v1974_v59 }
 0x212   : > { %v3636_v9 = vpop.f32.mrf.mxu1  ;;  %v1973_v57 = vld [vmem:[#allocation3 + $0x60] sm:$0xff]  ;;  %v2178_v14 = vld [vmem:[#allocation3 + $0x48] sm:$0xff] }
 0x213   : > { %2201 = vst.msk [vmem:[#allocation3] sm:$0xff] %vm351_vm1, %v2185_v50  ;;  %v2188_v60 = vadd.f32 %v3636_v9, %v2172_v54  ;;  %2006 = vst.msk [vmem:[#allocation3 + $0x68] sm:$0xff] %vm351_vm1, %v1990_v53  ;;  %v1989_v8 = vadd.f32 %v1973_v57, %v4731_v16  ;;  %v4865_v50 = vpop.f32.mrf.mxu0 }
 0x214   : > { %v2100_v44 = vpop.f32.mrf.mxu1  ;;  %v1976_v33 = vld [vmem:[#allocation3 + $0x78] sm:$0xff]  ;;  %v2177_v22 = vld [vmem:[#allocation3 + $0x40] sm:$0xff] }
 0x215   : > { %2204 = vst.msk [vmem:[#allocation3 + $0x18] sm:$0xff] %vm351_vm1, %v2188_v60  ;;  %v2187_v39 = vadd.f32 %v2171_v28, %v2100_v44  ;;  %2005 = vst.msk [vmem:[#allocation3 + $0x60] sm:$0xff] %vm351_vm1, %v1989_v8  ;;  %v1992_v19 = vadd.f32 %v4736_v21, %v1976_v33  ;;  %v4873_v33 = vpop.f32.mrf.mxu0 }
 0x216   : > { %v3639_v11 = vpop.f32.mrf.mxu1  ;;  %v1975_v42 = vld [vmem:[#allocation3 + $0x70] sm:$0xff]  ;;  %v2180_v4 = vld [vmem:[#allocation3 + $0x58] sm:$0xff] }
 0x217   : > { %2203 = vst.msk [vmem:[#allocation3 + $0x10] sm:$0xff] %vm351_vm1, %v2187_v39  ;;  %v2190_v45 = vadd.f32 %v3639_v11, %v2174_v3  ;;  %2008 = vst.msk [vmem:[#allocation3 + $0x78] sm:$0xff] %vm351_vm1, %v1992_v19  ;;  %v1991_v16 = vadd.f32 %v1975_v42, %v4741_v34 }
 0x218   : > { %v2110_v49 = vpop.f32.mrf.mxu1  ;;  %v2380_v0 = vld [vmem:[#allocation3 + $0x8] sm:$0xff]  ;;  %v2179_v25 = vld [vmem:[#allocation3 + $0x50] sm:$0xff] }
 0x219   : > { %2206 = vst.msk [vmem:[#allocation3 + $0x28] sm:$0xff] %vm351_vm1, %v2190_v45  ;;  %v2189_v43 = vadd.f32 %v2173_v63, %v2110_v49  ;;  %2007 = vst.msk [vmem:[#allocation3 + $0x70] sm:$0xff] %vm351_vm1, %v1991_v16  ;;  %v2396_v21 = vadd.f32 %v4746_v47, %v2380_v0  ;;  %v4881_v63 = vpop.f32.mrf.mxu0 }
 0x21a   : > { %v3642_v52 = vpop.f32.mrf.mxu1  ;;  %v2379_v1 = vld [vmem:[#allocation3] sm:$0xff]  ;;  %v2182_v54 = vld [vmem:[#allocation3 + $0x68] sm:$0xff] }
 0x21b   : > { %2205 = vst.msk [vmem:[#allocation3 + $0x20] sm:$0xff] %vm351_vm1, %v2189_v43  ;;  %v2192_v32 = vadd.f32 %v3642_v52, %v2176_v38  ;;  %2412 = vst.msk [vmem:[#allocation3 + $0x8] sm:$0xff] %vm351_vm1, %v2396_v21  ;;  %v2395_v34 = vadd.f32 %v2379_v1, %v4751_v10 }
 0x21c   : > { %v2120_v58 = vpop.f32.mrf.mxu1  ;;  %v2382_v40 = vld [vmem:[#allocation3 + $0x18] sm:$0xff]  ;;  %v2181_v44 = vld [vmem:[#allocation3 + $0x60] sm:$0xff] }
 0x21d   : > { %2208 = vst.msk [vmem:[#allocation3 + $0x38] sm:$0xff] %vm351_vm1, %v2192_v32  ;;  %v2191_v35 = vadd.f32 %v2175_v27, %v2120_v58  ;;  %2411 = vst.msk [vmem:[#allocation3] sm:$0xff] %vm351_vm1, %v2395_v34  ;;  %v2398_v47 = vadd.f32 %v4756_v17, %v2382_v40  ;;  %v4889_v58 = vpop.f32.mrf.mxu0 }
 0x21e   : > { %v3645_v62 = vpop.f32.mrf.mxu1  ;;  %v2381_v26 = vld [vmem:[#allocation3 + $0x10] sm:$0xff]  ;;  %v2184_v11 = vld [vmem:[#allocation3 + $0x78] sm:$0xff] }
 0x21f   : > { %2207 = vst.msk [vmem:[#allocation3 + $0x30] sm:$0xff] %vm351_vm1, %v2191_v35  ;;  %v2194_v2 = vadd.f32 %v3645_v62, %v2178_v14  ;;  %2414 = vst.msk [vmem:[#allocation3 + $0x18] sm:$0xff] %vm351_vm1, %v2398_v47  ;;  %v2397_v10 = vadd.f32 %v2381_v26, %v4761_v41 }
 0x220   : > { %v2130_v18 = vpop.f32.mrf.mxu1  ;;  %v2384_v61 = vld [vmem:[#allocation3 + $0x28] sm:$0xff]  ;;  %v2183_v16 = vld [vmem:[#allocation3 + $0x70] sm:$0xff] }
 0x221   : > { %2210 = vst.msk [vmem:[#allocation3 + $0x48] sm:$0xff] %vm351_vm1, %v2194_v2  ;;  %v2193_v13 = vadd.f32 %v2177_v22, %v2130_v18  ;;  %2413 = vst.msk [vmem:[#allocation3 + $0x10] sm:$0xff] %vm351_vm1, %v2397_v10  ;;  %v2400_v17 = vadd.f32 %v4766_v56, %v2384_v61  ;;  %v4897_v10 = vpop.f32.mrf.mxu0 }
 0x222   : > { %v3648_v20 = vpop.f32.mrf.mxu1  ;;  %v2383_v7 = vld [vmem:[#allocation3 + $0x20] sm:$0xff]  ;;  %v2582_v21 = vld [vmem:[#allocation3 + $0x8] sm:$0xff] }
 0x223   : > { %2209 = vst.msk [vmem:[#allocation3 + $0x40] sm:$0xff] %vm351_vm1, %v2193_v13  ;;  %v2196_v15 = vadd.f32 %v3648_v20, %v2180_v4  ;;  %2416 = vst.msk [vmem:[#allocation3 + $0x28] sm:$0xff] %vm351_vm1, %v2400_v17  ;;  %v2399_v41 = vadd.f32 %v2383_v7, %v4771_v29 }
 0x224   : > { %v2140_v31 = vpop.f32.mrf.mxu1  ;;  %v2386_v59 = vld [vmem:[#allocation3 + $0x38] sm:$0xff]  ;;  %v2581_v32 = vld [vmem:[#allocation3] sm:$0xff] }
 0x225   : > { %2212 = vst.msk [vmem:[#allocation3 + $0x58] sm:$0xff] %vm351_vm1, %v2196_v15  ;;  %v2195_v53 = vadd.f32 %v2179_v25, %v2140_v31  ;;  %2415 = vst.msk [vmem:[#allocation3 + $0x20] sm:$0xff] %vm351_vm1, %v2399_v41  ;;  %v2402_v56 = vadd.f32 %v4776_v30, %v2386_v59  ;;  %v4905_v15 = vpop.f32.mrf.mxu0 }
 0x226   : > { %v3651_v9 = vpop.f32.mrf.mxu1  ;;  %v2385_v57 = vld [vmem:[#allocation3 + $0x30] sm:$0xff]  ;;  %v2584_v35 = vld [vmem:[#allocation3 + $0x18] sm:$0xff] }
 0x227   : > { %2211 = vst.msk [vmem:[#allocation3 + $0x50] sm:$0xff] %vm351_vm1, %v2195_v53  ;;  %v2198_v60 = vadd.f32 %v3651_v9, %v2182_v54  ;;  %2418 = vst.msk [vmem:[#allocation3 + $0x38] sm:$0xff] %vm351_vm1, %v2402_v56  ;;  %v2401_v29 = vadd.f32 %v2385_v57, %v4781_v24  ;;  %v4913_v57 = vpop.f32.mrf.mxu0 }
 0x228   : > { %v2150_v8 = vpop.f32.mrf.mxu1  ;;  %v2388_v28 = vld [vmem:[#allocation3 + $0x48] sm:$0xff]  ;;  %v2583_v26 = vld [vmem:[#allocation3 + $0x10] sm:$0xff] }
 0x229   : > { %2214 = vst.msk [vmem:[#allocation3 + $0x68] sm:$0xff] %vm351_vm1, %v2198_v60  ;;  %v2197_v39 = vadd.f32 %v2181_v44, %v2150_v8  ;;  %2417 = vst.msk [vmem:[#allocation3 + $0x30] sm:$0xff] %vm351_vm1, %v2401_v29  ;;  %v2404_v30 = vadd.f32 %v4786_v46, %v2388_v28 }
 0x22a   : > { %v3654_v19 = vpop.f32.mrf.mxu1  ;;  %v2387_v3 = vld [vmem:[#allocation3 + $0x40] sm:$0xff]  ;;  %v2586_v61 = vld [vmem:[#allocation3 + $0x28] sm:$0xff] }
 0x22b   : > { %2213 = vst.msk [vmem:[#allocation3 + $0x60] sm:$0xff] %vm351_vm1, %v2197_v39  ;;  %v2200_v42 = vadd.f32 %v3654_v19, %v2184_v11  ;;  %2420 = vst.msk [vmem:[#allocation3 + $0x48] sm:$0xff] %vm351_vm1, %v2404_v30  ;;  %v2403_v24 = vadd.f32 %v2387_v3, %v4794_v6  ;;  %v4924_v39 = vld [vmem:[%s5068_s5] ss:$0 sm:$0xff]  ;;  %v4926_v11 = vpop.f32.mrf.mxu0  ;;  %v4931_v3 = vld [vmem:[%s5068_s5 + $0x1] ss:$0 sm:$0xff] }
 0x22c   : > { %v2160_v45 = vpop.f32.mrf.mxu1  ;;  %v2390_v49 = vld [vmem:[#allocation3 + $0x58] sm:$0xff]  ;;  %v2585_v7 = vld [vmem:[#allocation3 + $0x20] sm:$0xff] }
 0x22d   : > { %2216 = vst.msk [vmem:[#allocation3 + $0x78] sm:$0xff] %vm351_vm1, %v2200_v42  ;;  %v2199_v0 = vadd.f32 %v2183_v16, %v2160_v45  ;;  %2419 = vst.msk [vmem:[#allocation3 + $0x40] sm:$0xff] %vm351_vm1, %v2403_v24  ;;  %v2406_v46 = vadd.f32 %v4802_v37, %v2390_v49 }
 0x22e   : > { %v3685_v43 = vpop.f32.mrf.mxu1  ;;  %v2389_v52 = vld [vmem:[#allocation3 + $0x50] sm:$0xff]  ;;  %v2588_v59 = vld [vmem:[#allocation3 + $0x38] sm:$0xff] }
 0x22f   : > { %2215 = vst.msk [vmem:[#allocation3 + $0x70] sm:$0xff] %vm351_vm1, %v2199_v0  ;;  %v2598_v38 = vadd.f32 %v3685_v43, %v2582_v21  ;;  %2422 = vst.msk [vmem:[#allocation3 + $0x58] sm:$0xff] %vm351_vm1, %v2406_v46  ;;  %v2405_v6 = vadd.f32 %v2389_v52, %v4809_v51 }
 0x230   : > { %v2502_v1 = vpop.f32.mrf.mxu1  ;;  %v2392_v34 = vld [vmem:[#allocation3 + $0x68] sm:$0xff]  ;;  %v2587_v54 = vld [vmem:[#allocation3 + $0x30] sm:$0xff] }
 0x231   : > { %2614 = vst.msk [vmem:[#allocation3 + $0x8] sm:$0xff] %vm351_vm1, %v2598_v38  ;;  %v2597_v27 = vadd.f32 %v2581_v32, %v2502_v1  ;;  %2421 = vst.msk [vmem:[#allocation3 + $0x50] sm:$0xff] %vm351_vm1, %v2405_v6  ;;  %v2408_v37 = vadd.f32 %v4817_v36, %v2392_v34  ;;  %v3726_v6 = vpop.f32.mrf.mxu0 }
 0x232   : > { %v3688_v40 = vpop.f32.mrf.mxu1  ;;  %v2391_v47 = vld [vmem:[#allocation3 + $0x60] sm:$0xff]  ;;  %v2590_v44 = vld [vmem:[#allocation3 + $0x48] sm:$0xff] }
 0x233   : > { %2613 = vst.msk [vmem:[#allocation3] sm:$0xff] %vm351_vm1, %v2597_v27  ;;  %v2600_v62 = vadd.f32 %v3688_v40, %v2584_v35  ;;  %2424 = vst.msk [vmem:[#allocation3 + $0x68] sm:$0xff] %vm351_vm1, %v2408_v37  ;;  %v2407_v51 = vadd.f32 %v2391_v47, %v4825_v48 }
 0x234   : > { %v2512_v14 = vpop.f32.mrf.mxu1  ;;  %v2394_v2 = vld [vmem:[#allocation3 + $0x78] sm:$0xff]  ;;  %v2589_v19 = vld [vmem:[#allocation3 + $0x40] sm:$0xff] }
 0x235   : > { %2616 = vst.msk [vmem:[#allocation3 + $0x18] sm:$0xff] %vm351_vm1, %v2600_v62  ;;  %v2599_v18 = vadd.f32 %v2583_v26, %v2512_v14  ;;  %2423 = vst.msk [vmem:[#allocation3 + $0x60] sm:$0xff] %vm351_vm1, %v2407_v51  ;;  %v2410_v36 = vadd.f32 %v4833_v12, %v2394_v2 }
 0x236   : > { %v3691_v22 = vpop.f32.mrf.mxu1  ;;  %v2393_v13 = vld [vmem:[#allocation3 + $0x70] sm:$0xff]  ;;  %v2592_v49 = vld [vmem:[#allocation3 + $0x58] sm:$0xff] }
 0x237   : > { %2615 = vst.msk [vmem:[#allocation3 + $0x10] sm:$0xff] %vm351_vm1, %v2599_v18  ;;  %v2602_v17 = vadd.f32 %v3691_v22, %v2586_v61  ;;  %2426 = vst.msk [vmem:[#allocation3 + $0x78] sm:$0xff] %vm351_vm1, %v2410_v36  ;;  %v2409_v48 = vadd.f32 %v2393_v13, %v4841_v55  ;;  %v2760_v36 = vpop.f32.mrf.mxu0 }
 0x238   : > { %v2790_v20 = vld [vmem:[#allocation3 + $0x8] sm:$0xff]  ;;  %v2522_v4 = vpop.f32.mrf.mxu1 }
 0x239   : > { %v2806_v41 = vadd.f32 %v4849_v5, %v2790_v20  ;;  %2618 = vst.msk [vmem:[#allocation3 + $0x28] sm:$0xff] %vm351_vm1, %v2602_v17  ;;  %v2601_v12 = vadd.f32 %v2585_v7, %v2522_v4  ;;  %2425 = vst.msk [vmem:[#allocation3 + $0x70] sm:$0xff] %vm351_vm1, %v2409_v48  ;;  %v3776_v48 = vld [vmem:[%s3919_s19 + $0x8] sm:$0xff] }
 0x23a   : > { %v2789_v31 = vld [vmem:[#allocation3] sm:$0xff]  ;;  %v3694_v25 = vpop.f32.mrf.mxu1  ;;  %v2594_v51 = vld [vmem:[#allocation3 + $0x68] sm:$0xff] }
 0x23b   : > { %2822 = vst.msk [vmem:[#allocation3 + $0x8] sm:$0xff] %vm351_vm1, %v2806_v41  ;;  %v2805_v53 = vadd.f32 %v2789_v31, %v4857_v23  ;;  %2617 = vst.msk [vmem:[#allocation3 + $0x20] sm:$0xff] %vm351_vm1, %v2601_v12  ;;  %v2604_v55 = vadd.f32 %v3694_v25, %v2588_v59 }
 0x23c   : > { %v2792_v56 = vld [vmem:[#allocation3 + $0x18] sm:$0xff]  ;;  %v2532_v9 = vpop.f32.mrf.mxu1  ;;  %v2593_v17 = vld [vmem:[#allocation3 + $0x60] sm:$0xff] }
 0x23d   : > { %2821 = vst.msk [vmem:[#allocation3] sm:$0xff] %vm351_vm1, %v2805_v53  ;;  %v2808_v5 = vadd.f32 %v4865_v50, %v2792_v56  ;;  %2620 = vst.msk [vmem:[#allocation3 + $0x38] sm:$0xff] %vm351_vm1, %v2604_v55  ;;  %v2603_v60 = vadd.f32 %v2587_v54, %v2532_v9  ;;  %v3777_v56 = vld [vmem:[%s3919_s19] sm:$0xff] }
 0x23e   : > { %v2791_v29 = vld [vmem:[#allocation3 + $0x10] sm:$0xff]  ;;  %v3697_v8 = vpop.f32.mrf.mxu1  ;;  %v2596_v55 = vld [vmem:[#allocation3 + $0x78] sm:$0xff] }
 0x23f   : > { %2824 = vst.msk [vmem:[#allocation3 + $0x18] sm:$0xff] %vm351_vm1, %v2808_v5  ;;  %v2807_v23 = vadd.f32 %v2791_v29, %v4873_v33  ;;  %2619 = vst.msk [vmem:[#allocation3 + $0x30] sm:$0xff] %vm351_vm1, %v2603_v60  ;;  %v2606_v28 = vadd.f32 %v3697_v8, %v2590_v44  ;;  %v3729_v44 = vpop.f32.mrf.mxu0 }
 0x240   : > { %v2794_v30 = vld [vmem:[#allocation3 + $0x28] sm:$0xff]  ;;  %v2542_v50 = vpop.f32.mrf.mxu1 }
 0x241   : > { %2823 = vst.msk [vmem:[#allocation3 + $0x10] sm:$0xff] %vm351_vm1, %v2807_v23  ;;  %v2810_v33 = vadd.f32 %v4881_v63, %v2794_v30  ;;  %2622 = vst.msk [vmem:[#allocation3 + $0x48] sm:$0xff] %vm351_vm1, %v2606_v28  ;;  %v2605_v42 = vadd.f32 %v2589_v19, %v2542_v50  ;;  %v2591_v63 = vld [vmem:[#allocation3 + $0x50] sm:$0xff] }
 0x242   : > { %v2838_v24 = vld [vmem:[#allocation3 + $0x8] sm:$0xff]  ;;  %v2793_v45 = vld [vmem:[#allocation3 + $0x20] sm:$0xff]  ;;  %v3700_v16 = vpop.f32.mrf.mxu1  ;;  %v2595_v19 = vld [vmem:[#allocation3 + $0x70] sm:$0xff] }
 0x243   : > { %v2859_v0 = vmul.f32 %v4924_v39, %v2838_v24  ;;  %2826 = vst.msk [vmem:[#allocation3 + $0x28] sm:$0xff] %vm351_vm1, %v2810_v33  ;;  %v2809_v46 = vadd.f32 %v2793_v45, %v4889_v58  ;;  %2621 = vst.msk [vmem:[#allocation3 + $0x40] sm:$0xff] %vm351_vm1, %v2605_v42  ;;  %v2608_v43 = vadd.f32 %v3700_v16, %v2592_v49  ;;  %v3778_v33 = vld [vmem:[%s3919_s19 + $0x18] sm:$0xff] }
 0x244   : > { %v2837_v21 = vld [vmem:[#allocation3] sm:$0xff]  ;;  %v2796_v52 = vld [vmem:[#allocation3 + $0x38] sm:$0xff]  ;;  %v2552_v38 = vpop.f32.mrf.mxu1 }
 0x245   : > { %v2880_v1 = vadd.f32 %v4931_v3, %v2859_v0  ;;  %v2858_v32 = vmul.f32 %v4924_v39, %v2837_v21  ;;  %2825 = vst.msk [vmem:[#allocation3 + $0x20] sm:$0xff] %vm351_vm1, %v2809_v46  ;;  %v2812_v34 = vadd.f32 %v4897_v10, %v2796_v52  ;;  %2624 = vst.msk [vmem:[#allocation3 + $0x58] sm:$0xff] %vm351_vm1, %v2608_v43  ;;  %v2770_v52 = vpop.f32.mrf.mxu0 }
 0x246   : > { %v2607_v27 = vadd.f32 %v2591_v63, %v2552_v38  ;;  %v2840_v58 = vld [vmem:[#allocation3 + $0x18] sm:$0xff]  ;;  %v2795_v37 = vld [vmem:[#allocation3 + $0x30] sm:$0xff]  ;;  %v3703_v40 = vpop.f32.mrf.mxu1 }
 0x247   : > { %vm2896_vm2 = vcmp.gt.f32.partialorder %v2880_v1, 0.0  ;;  %v2912_v35 = vmul.f32 0.1, %v2880_v1  ;;  %v2879_v47 = vadd.f32 %v4931_v3, %v2858_v32  ;;  %v2861_v62 = vmul.f32 %v4924_v39, %v2840_v58  ;;  %2828 = vst.msk [vmem:[#allocation3 + $0x38] sm:$0xff] %vm351_vm1, %v2812_v34  ;;  %v3779_v38 = vld [vmem:[%s3919_s19 + $0x10] sm:$0xff] }
 0x248   : > { %2623 = vst.msk [vmem:[#allocation3 + $0x50] sm:$0xff] %vm351_vm1, %v2607_v27  ;;  %v2839_v14 = vld [vmem:[#allocation3 + $0x10] sm:$0xff]  ;;  %v2811_v26 = vadd.f32 %v2795_v37, %v4905_v15  ;;  %v2798_v2 = vld [vmem:[#allocation3 + $0x48] sm:$0xff]  ;;  %v2610_v10 = vadd.f32 %v3703_v40, %v2594_v51  ;;  %v2562_v18 = vpop.f32.mrf.mxu1 }
 0x249   : > { %v2928_v22 = vsel %vm2896_vm2, %v2880_v1, %v2912_v35  ;;  %vm2895_vm4 = vcmp.gt.f32.partialorder %v2879_v47, 0.0  ;;  %v2911_v61 = vmul.f32 0.1, %v2879_v47  ;;  %v2882_v13 = vadd.f32 %v4931_v3, %v2861_v62  ;;  %v3780_v27 = vld [vmem:[%s3919_s19 + $0x28] sm:$0xff] }
 0x24a   : > { %v2944_v20 = vadd.f32 %v3776_v48, %v2928_v22  ;;  %v2860_v4 = vmul.f32 %v4924_v39, %v2839_v14  ;;  %v2842_v7 = vld [vmem:[#allocation3 + $0x28] sm:$0xff]  ;;  %2827 = vst.msk [vmem:[#allocation3 + $0x30] sm:$0xff] %vm351_vm1, %v2811_v26  ;;  %v2814_v15 = vadd.f32 %v4913_v57, %v2798_v2  ;;  %v2797_v41 = vld [vmem:[#allocation3 + $0x40] sm:$0xff]  ;;  %2626 = vst.msk [vmem:[#allocation3 + $0x68] sm:$0xff] %vm351_vm1, %v2610_v10  ;;  %v3706_v31 = vpop.f32.mrf.mxu1 }
 0x24b   : > { %v2609_v12 = vadd.f32 %v2593_v17, %v2562_v18  ;;  %v2927_v25 = vsel %vm2895_vm4, %v2879_v47, %v2911_v61  ;;  %vm2898_vm12 = vcmp.gt.f32.partialorder %v2882_v13, 0.0  ;;  %v2914_v59 = vmul.f32 0.1, %v2882_v13  ;;  %v3732_v47 = vpop.f32.mrf.mxu0  ;;  %v3781_v26 = vld [vmem:[%s3919_s19 + $0x20] sm:$0xff] }
 0x24c   : > { %v2863_v53 = vmul.f32 %v4924_v39, %v2842_v7  ;;  %2960 = vst.msk [vmem:[%s4955_s21 + $0x8] sm:$0xff] %vm351_vm1, %v2944_v20  ;;  %v2943_v9 = vadd.f32 %v3777_v56, %v2927_v25  ;;  %v2881_v54 = vadd.f32 %v4931_v3, %v2860_v4  ;;  %v2841_v57 = vld [vmem:[#allocation3 + $0x20] sm:$0xff]  ;;  %2830 = vst.msk [vmem:[#allocation3 + $0x48] sm:$0xff] %vm351_vm1, %v2814_v15  ;;  %v2800_v60 = vld [vmem:[#allocation3 + $0x58] sm:$0xff]  ;;  %v2572_v8 = vpop.f32.mrf.mxu1 }
 0x24d   : > { %v2813_v5 = vadd.f32 %v2797_v41, %v4926_v11  ;;  %2625 = vst.msk [vmem:[#allocation3 + $0x60] sm:$0xff] %vm351_vm1, %v2609_v12  ;;  %v2612_v29 = vadd.f32 %v3706_v31, %v2596_v55  ;;  %v2930_v23 = vsel %vm2898_vm12, %v2882_v13, %v2914_v59  ;;  %v2862_v30 = vmul.f32 %v4924_v39, %v2841_v57  ;;  %v2780_v7 = vpop.f32.mrf.mxu0  ;;  %v3782_v15 = vld [vmem:[%s3919_s19 + $0x38] sm:$0xff] }
 0x24e   : > { %v2884_v28 = vadd.f32 %v4931_v3, %v2863_v53  ;;  %v2816_v50 = vadd.f32 %v3726_v6, %v2800_v60  ;;  %2959 = vst.msk [vmem:[%s4955_s21] sm:$0xff] %vm351_vm1, %v2943_v9  ;;  %v2946_v42 = vadd.f32 %v3778_v33, %v2930_v23  ;;  %vm2897_vm13 = vcmp.gt.f32.partialorder %v2881_v54, 0.0  ;;  %v2844_v24 = vld [vmem:[#allocation3 + $0x38] sm:$0xff]  ;;  %v3783_v9 = vld [vmem:[%s3919_s19 + $0x30] sm:$0xff] }
 0x24f   : > { %v2913_v11 = vmul.f32 0.1, %v2881_v54  ;;  %2829 = vst.msk [vmem:[#allocation3 + $0x40] sm:$0xff] %vm351_vm1, %v2813_v5  ;;  %v2799_v45 = vld [vmem:[#allocation3 + $0x50] sm:$0xff]  ;;  %2628 = vst.msk [vmem:[#allocation3 + $0x78] sm:$0xff] %vm351_vm1, %v2612_v29  ;;  %v2611_v16 = vadd.f32 %v2595_v19, %v2572_v8  ;;  %v2883_v0 = vadd.f32 %v4931_v3, %v2862_v30  ;;  %v2865_v46 = vmul.f32 %v4924_v39, %v2844_v24  ;;  %v3784_v30 = vld [vmem:[%s3919_s19 + $0x48] sm:$0xff] }
 0x250   : > { %vm2900_vm5 = vcmp.gt.f32.partialorder %v2884_v28, 0.0  ;;  %v2916_v49 = vmul.f32 0.1, %v2884_v28  ;;  %2832 = vst.msk [vmem:[#allocation3 + $0x58] sm:$0xff] %vm351_vm1, %v2816_v50  ;;  %2962 = vst.msk [vmem:[%s4955_s21 + $0x18] sm:$0xff] %vm351_vm1, %v2946_v42  ;;  %v2815_v21 = vadd.f32 %v2799_v45, %v2760_v36 }
 0x251   : > { %v2929_v43 = vsel %vm2897_vm13, %v2881_v54, %v2913_v11  ;;  %2627 = vst.msk [vmem:[#allocation3 + $0x70] sm:$0xff] %vm351_vm1, %v2611_v16  ;;  %vm2899_vm6 = vcmp.gt.f32.partialorder %v2883_v0, 0.0  ;;  %v2915_v1 = vmul.f32 0.1, %v2883_v0  ;;  %v2843_v32 = vld [vmem:[#allocation3 + $0x30] sm:$0xff]  ;;  %v2802_v34 = vld [vmem:[#allocation3 + $0x68] sm:$0xff]  ;;  %v2886_v37 = vadd.f32 %v4931_v3, %v2865_v46 }
 0x252   : > { %v2945_v63 = vadd.f32 %v3779_v38, %v2929_v43  ;;  %v2932_v6 = vsel %vm2900_vm5, %v2884_v28, %v2916_v49  ;;  %v2864_v40 = vmul.f32 %v4924_v39, %v2843_v32  ;;  %2831 = vst.msk [vmem:[#allocation3 + $0x50] sm:$0xff] %vm351_vm1, %v2815_v21  ;;  %v2818_v35 = vadd.f32 %v3729_v44, %v2802_v34  ;;  %v3785_v11 = vld [vmem:[%s3919_s19 + $0x40] sm:$0xff]  ;;  %v3786_v16 = vld [vmem:[%s3919_s19 + $0x58] sm:$0xff] }
 0x253   : > { %v2948_v58 = vadd.f32 %v3780_v27, %v2932_v6  ;;  %v2931_v62 = vsel %vm2899_vm6, %v2883_v0, %v2915_v1  ;;  %v2846_v51 = vld [vmem:[#allocation3 + $0x48] sm:$0xff]  ;;  %vm2902_vm7 = vcmp.gt.f32.partialorder %v2886_v37, 0.0  ;;  %v2918_v10 = vmul.f32 0.1, %v2886_v37  ;;  %v3787_v6 = vld [vmem:[%s3919_s19 + $0x50] sm:$0xff] }
 0x254   : > { %2961 = vst.msk [vmem:[%s4955_s21 + $0x10] sm:$0xff] %vm351_vm1, %v2945_v63  ;;  %v2801_v14 = vld [vmem:[#allocation3 + $0x60] sm:$0xff]  ;;  %v2947_v2 = vadd.f32 %v3781_v26, %v2931_v62  ;;  %v2885_v18 = vadd.f32 %v4931_v3, %v2864_v40  ;;  %2834 = vst.msk [vmem:[#allocation3 + $0x68] sm:$0xff] %vm351_vm1, %v2818_v35  ;;  %v2867_v36 = vmul.f32 %v4924_v39, %v2846_v51  ;;  %v3788_v40 = vld [vmem:[%s3919_s19 + $0x68] sm:$0xff] }
 0x255   : > { %2964 = vst.msk [vmem:[%s4955_s21 + $0x28] sm:$0xff] %vm351_vm1, %v2948_v58  ;;  %v2817_v61 = vadd.f32 %v2801_v14, %v2770_v52  ;;  %v2934_v17 = vsel %vm2902_vm7, %v2886_v37, %v2918_v10  ;;  %v3789_v26 = vld [vmem:[%s3919_s19 + $0x60] sm:$0xff] }
 0x256   : > { %v2845_v22 = vld [vmem:[#allocation3 + $0x40] sm:$0xff]  ;;  %v2804_v13 = vld [vmem:[#allocation3 + $0x78] sm:$0xff]  ;;  %2963 = vst.msk [vmem:[%s4955_s21 + $0x20] sm:$0xff] %vm351_vm1, %v2947_v2  ;;  %vm2901_vm8 = vcmp.gt.f32.partialorder %v2885_v18, 0.0  ;;  %v2917_v48 = vmul.f32 0.1, %v2885_v18  ;;  %v2950_v41 = vadd.f32 %v3782_v15, %v2934_v17  ;;  %v2888_v12 = vadd.f32 %v4931_v3, %v2867_v36 }
 0x257   : > { %v2866_v20 = vmul.f32 %v4924_v39, %v2845_v22  ;;  %v2848_v4 = vld [vmem:[#allocation3 + $0x58] sm:$0xff]  ;;  %2833 = vst.msk [vmem:[#allocation3 + $0x60] sm:$0xff] %vm351_vm1, %v2817_v61  ;;  %v2820_v25 = vadd.f32 %v3732_v47, %v2804_v13  ;;  %v3791_v13 = vld [vmem:[%s3919_s19 + $0x70] sm:$0xff] }
 0x258   : > { %v2869_v31 = vmul.f32 %v4924_v39, %v2848_v4  ;;  %v2803_v59 = vld [vmem:[#allocation3 + $0x70] sm:$0xff]  ;;  %v2933_v53 = vsel %vm2901_vm8, %v2885_v18, %v2917_v48  ;;  %2966 = vst.msk [vmem:[%s4955_s21 + $0x38] sm:$0xff] %vm351_vm1, %v2950_v41  ;;  %vm2904_vm9 = vcmp.gt.f32.partialorder %v2888_v12, 0.0  ;;  %v2920_v57 = vmul.f32 0.1, %v2888_v12  ;;  %v3790_v36 = vld [vmem:[%s3919_s19 + $0x78] sm:$0xff] }
 0x259   : > { %v2887_v55 = vadd.f32 %v4931_v3, %v2866_v20  ;;  %v2819_v56 = vadd.f32 %v2803_v59, %v2780_v7  ;;  %v2949_v54 = vadd.f32 %v3783_v9, %v2933_v53  ;;  %v2847_v60 = vld [vmem:[#allocation3 + $0x50] sm:$0xff]  ;;  %2836 = vst.msk [vmem:[#allocation3 + $0x78] sm:$0xff] %vm351_vm1, %v2820_v25 }
 0x25a   : > { %v2890_v5 = vadd.f32 %v4931_v3, %v2869_v31  ;;  %v2868_v8 = vmul.f32 %v4924_v39, %v2847_v60  ;;  %v2936_v44 = vsel %vm2904_vm9, %v2888_v12, %v2920_v57 }
 0x25b   : > { %vm2903_vm10 = vcmp.gt.f32.partialorder %v2887_v55, 0.0  ;;  %v2919_v29 = vmul.f32 0.1, %v2887_v55  ;;  %2835 = vst.msk [vmem:[#allocation3 + $0x70] sm:$0xff] %vm351_vm1, %v2819_v56  ;;  %2965 = vst.msk [vmem:[%s4955_s21 + $0x30] sm:$0xff] %vm351_vm1, %v2949_v54  ;;  %v2850_v28 = vld [vmem:[#allocation3 + $0x68] sm:$0xff]  ;;  %v2952_v50 = vadd.f32 %v3784_v30, %v2936_v44 }
 0x25c   : > { %vm2906_vm11 = vcmp.gt.f32.partialorder %v2890_v5, 0.0  ;;  %v2922_v23 = vmul.f32 0.1, %v2890_v5  ;;  %v2889_v33 = vadd.f32 %v4931_v3, %v2868_v8  ;;  %v2871_v42 = vmul.f32 %v4924_v39, %v2850_v28 }
 0x25d   : > { %v2935_v19 = vsel %vm2903_vm10, %v2887_v55, %v2919_v29  ;;  %2968 = vst.msk [vmem:[%s4955_s21 + $0x48] sm:$0xff] %vm351_vm1, %v2952_v50 }
 0x25e   : > { %v2951_v24 = vadd.f32 %v3785_v11, %v2935_v19  ;;  %v2938_v45 = vsel %vm2906_vm11, %v2890_v5, %v2922_v23  ;;  %vm2905_vm14 = vcmp.gt.f32.partialorder %v2889_v33, 0.0  ;;  %v2921_v0 = vmul.f32 0.1, %v2889_v33  ;;  %v2849_v43 = vld [vmem:[#allocation3 + $0x60] sm:$0xff] }
 0x25f   : > { %v2954_v49 = vadd.f32 %v3786_v16, %v2938_v45  ;;  %v2892_v46 = vadd.f32 %v4931_v3, %v2871_v42  ;;  %v2870_v21 = vmul.f32 %v4924_v39, %v2849_v43 }
 0x260   : > { %2967 = vst.msk [vmem:[%s4955_s21 + $0x40] sm:$0xff] %vm351_vm1, %v2951_v24  ;;  %v2937_v52 = vsel %vm2905_vm14, %v2889_v33, %v2921_v0  ;;  %v2852_v63 = vld [vmem:[#allocation3 + $0x78] sm:$0xff] }
 0x261   : > { %2970 = vst.msk [vmem:[%s4955_s21 + $0x58] sm:$0xff] %vm351_vm1, %v2954_v49  ;;  %vm2908_vm15 = vcmp.gt.f32.partialorder %v2892_v46, 0.0  ;;  %v2924_v38 = vmul.f32 0.1, %v2892_v46  ;;  %v2953_v1 = vadd.f32 %v3787_v6, %v2937_v52  ;;  %v2891_v32 = vadd.f32 %v4931_v3, %v2870_v21 }
 0x262   : > { %v2873_v34 = vmul.f32 %v4924_v39, %v2852_v63  ;;  %v2851_v27 = vld [vmem:[#allocation3 + $0x70] sm:$0xff] }
 0x263   : > { %v2940_v58 = vsel %vm2908_vm15, %v2892_v46, %v2924_v38  ;;  %v2872_v37 = vmul.f32 %v4924_v39, %v2851_v27  ;;  %2969 = vst.msk [vmem:[%s4955_s21 + $0x50] sm:$0xff] %vm351_vm1, %v2953_v1  ;;  %vm2907_vm0 = vcmp.gt.f32.partialorder %v2891_v32, 0.0  ;;  %v2923_v47 = vmul.f32 0.1, %v2891_v32 }
 0x264   : > { %v2956_v35 = vadd.f32 %v3788_v40, %v2940_v58  ;;  %v2894_v62 = vadd.f32 %v4931_v3, %v2873_v34 }
 0x265   : > { %v2893_v51 = vadd.f32 %v4931_v3, %v2872_v37  ;;  %v2939_v14 = vsel %vm2907_vm0, %v2891_v32, %v2923_v47 }
 0x266   : > { %2972 = vst.msk [vmem:[%s4955_s21 + $0x68] sm:$0xff] %vm351_vm1, %v2956_v35  ;;  %vm2910_vm3 = vcmp.gt.f32.partialorder %v2894_v62, 0.0  ;;  %v2926_v39 = vmul.f32 0.1, %v2894_v62  ;;  %v2955_v2 = vadd.f32 %v3789_v26, %v2939_v14 }
 0x267   : > { %vm2909_vm2 = vcmp.gt.f32.partialorder %v2893_v51, 0.0  ;;  %v2925_v10 = vmul.f32 0.1, %v2893_v51 }
 0x268   : > { %v2942_v18 = vsel %vm2910_vm3, %v2894_v62, %v2926_v39  ;;  %2971 = vst.msk [vmem:[%s4955_s21 + $0x60] sm:$0xff] %vm351_vm1, %v2955_v2 }
 0x269   : > { %v2958_v22 = vadd.f32 %v3790_v36, %v2942_v18  ;;  %v2941_v61 = vsel %vm2909_vm2, %v2893_v51, %v2925_v10 }
 0x26a   : > { %v2957_v17 = vadd.f32 %v3791_v13, %v2941_v61 }
 0x26b   : > { %2974 = vst.msk [vmem:[%s4955_s21 + $0x78] sm:$0xff] %vm351_vm1, %v2958_v22 }
 0x26c   : > { %2973 = vst.msk [vmem:[%s4955_s21 + $0x70] sm:$0xff] %vm351_vm1, %v2957_v17 }
 0x26d PF: > { %s16_s25 = sadd.s32 1, %s3830_s25   ;;  %s5074_s21 = smov %s3822_s23 }
 0x26e   : > { %p13_p10 = scmp.ge.s32.totalorder %s16_s25, 6   ;;  %s5075_s22 = smov %s3826_s24 }
 0x26f   : > { %s5076_s23 = smov %s5079_s26  ;;  %s5077_s24 = smov %s5083_s27 }
 0x270   :  { %15 = sbr.rel (!%p13_p10) target bundleno = 3 (0x3), region = 85 }

</bundles_post_ra>
